<compile_context>
chip_gen: v7x
topology: tpu7x:2x2x1
jax: 0.10.0
libtpu: 0.0.40
codegen_flags: <defaults>
</compile_context>

<pallas_src>
import functools

import numpy as np
import jax
import jax.numpy as jnp
from jax.experimental import pallas as pl
from jax.experimental.pallas import tpu as pltpu

NUM_SEQUENCES = 2
OPS_PER_SEQUENCE = 2
NUM_OPS = NUM_SEQUENCES * OPS_PER_SEQUENCE

_MiB = 1 << 20


# --------------------------------------------------------------------------- #
# Kernels
# --------------------------------------------------------------------------- #
def _conv_seq_vpu_kernel(w_ref, x_ref, o_ref, *, img_h, img_w):
    """Roll/mask (VPU + XLU) path.

    w_ref : SMEM (NUM_OPS, 9) f32   flattened 3x3 weights, op 0 pre-scaled by 8
    x_ref : VMEM (gb, L) in-dtype   L = pack*H*W; each sublane row holds `pack`
                                    flattened images back to back (lane-dense)
    o_ref : VMEM (gb, L) in-dtype
    """
    _, L = x_ref.shape
    hw = img_h * img_w
    x = x_ref[...].astype(jnp.float32)

    # Flat-index boundary masks, hoisted (one iota + a few compares per call).
    # They implement zero padding and keep lane-packed images independent.
    lane = jax.lax.broadcasted_iota(jnp.int32, x.shape, 1)
    q = lane % hw if L != hw else lane          # pixel index within one image
    col = q % img_w
    m_row_up = q >= img_w                       # row r >= 1      (dr = -1 valid)
    m_row_dn = q < hw - img_w                   # row r <= H - 2  (dr = +1 valid)
    m_col_lt = col >= 1                         # col c >= 1      (dc = -1 valid)
    m_col_rt = col <= img_w - 2                 # col c <= W - 2  (dc = +1 valid)

    for op_idx in range(NUM_OPS):
        # Row-shifted variants shared by all three column taps (2 XLU rolls).
        r_up = jnp.where(m_row_up, pltpu.roll(x, shift=img_w, axis=1), 0.0)
        r_dn = jnp.where(m_row_dn, pltpu.roll(x, shift=L - img_w, axis=1), 0.0)

        def w(kr, kc, _op=op_idx):
            return w_ref[_op, kr * 3 + kc]

        # Column-wise weighted sums of the row variants (pure VPU).
        b_lt = w(0, 0) * r_up + w(1, 0) * x + w(2, 0) * r_dn   # taps with dc = -1
        b_md = w(0, 1) * r_up + w(1, 1) * x + w(2, 1) * r_dn   # taps with dc =  0
        b_rt = w(0, 2) * r_up + w(1, 2) * x + w(2, 2) * r_dn   # taps with dc = +1

        # Column shifts: 2 lane rolls + 2 scalar-zero selects (no zeros buffer).
        x = (b_md
             + jnp.where(m_col_lt, pltpu.roll(b_lt, shift=1, axis=1), 0.0)
             + jnp.where(m_col_rt, pltpu.roll(b_rt, shift=L - 1, axis=1), 0.0))

    # The three "x = x + x" doublings are folded into op-0's weights (x8 scale).
    o_ref[...] = x.astype(o_ref.dtype)


def _conv_seq_mxu_kernel(x_ref, m_ref, o_ref):
    """MXU path: the whole (linear) op chain as one flat-conv matrix.

    x_ref : VMEM (gb, L) in-dtype
    m_ref : VMEM (L, L) f32  block-diagonal composed conv-chain matrix (x8 scale
                             folded in); same block every grid step.
    o_ref : VMEM (gb, L) in-dtype
    """
    x = x_ref[...].astype(jnp.float32)
    y = jnp.dot(x, m_ref[...], preferred_element_type=jnp.float32,
                precision=jax.lax.Precision.HIGHEST)
    o_ref[...] = y.astype(o_ref.dtype)


# --------------------------------------------------------------------------- #
# Wrapper helpers
# --------------------------------------------------------------------------- #
def _flat_conv_matrix(w_flat, img_h, img_w, pack):
    """Compose the NUM_OPS 3x3 same-convs into one (L, L) flat-conv matrix."""
    hw = img_h * img_w
    # 9 constant 0/1 tap matrices: taps[k, q_in, q_out] = 1 iff output pixel
    # q_out reads input pixel q_in through tap k (cross-correlation, zero pad).
    taps = np.zeros((9, hw, hw), np.float32)
    for dr in (-1, 0, 1):
        for dc in (-1, 0, 1):
            k = (dr + 1) * 3 + (dc + 1)
            for r in range(img_h):
                rr = r + dr
                if not 0 <= rr < img_h:
                    continue
                for c in range(img_w):
                    cc = c + dc
                    if 0 <= cc < img_w:
                        taps[k, rr * img_w + cc, r * img_w + c] = 1.0
    taps = jnp.asarray(taps)
    per_op = jnp.einsum("ok,kqp->oqp", w_flat, taps,
                        precision=jax.lax.Precision.HIGHEST)
    m = per_op[0]
    for i in range(1, NUM_OPS):        # out = x @ M0 @ M1 @ ... (high precision)
        m = jnp.dot(m, per_op[i], precision=jax.lax.Precision.HIGHEST)
    if pack > 1:                       # packed images are independent blocks
        m = jnp.kron(jnp.eye(pack, dtype=m.dtype), m)
    return m


def _choose_block_rows(num_rows, row_bytes):
    """Per-step sublane block (multiple of 8, or full) and padded row count."""
    target = 1 * _MiB                  # ~1 MiB blocks already reach ~85% of HBM BW
    gb = max(8, (target // max(row_bytes, 1)) // 8 * 8)
    # Prefer >= 4 grid steps (>= 2 per v7x TensorCore) when there is enough work.
    if num_rows >= 4 * 8:
        gb = min(gb, max(8, (num_rows // 4) // 8 * 8))
    elif num_rows >= 2 * 8:
        gb = min(gb, max(8, (num_rows // 2) // 8 * 8))
    if gb >= num_rows:
        return num_rows, num_rows      # single block (full-dim block is legal)
    padded = -(-num_rows // gb) * gb
    return gb, padded


def _pick_path(L):
    """'mxu' on v6e/v7x-class chips for small images, else 'vpu'."""
    if L > 1024:                       # L x L flat-conv matrix no longer pays off
        return "vpu"
    try:
        kind = jax.devices()[0].device_kind.lower()
    except Exception:
        return "vpu"
    if any(v in kind for v in ("v2", "v3", "v4", "v5")):
        return "vpu"                   # weak MXU at f32 precision on v5e & older
    return "mxu"


# --------------------------------------------------------------------------- #
# Public entry point
# --------------------------------------------------------------------------- #
def op_sequences_add_conv2d(x_nchw, weights, *, force_path=None):
    """x_nchw: (N, 1, H, W), weights: (NUM_OPS, 3, 3) -> (N, 1, H, W)."""
    N, C, H, W = x_nchw.shape
    assert C == 1, "OpSequencesAddConv2d uses a single input/output channel"
    hw = H * W
    dtype = x_nchw.dtype
    itemsize = jnp.dtype(dtype).itemsize

    # Lane-dense flat layout via pure reshapes (no transposes, no dtype casts):
    # pack enough images per sublane row that the lane extent is >= 128.
    pack = 1 if hw >= 128 else -(-128 // hw)
    L = pack * hw

    # Fold every "x = x + x" (one per sequence + the final one) into op-0's
    # weights: the chain is linear, so one exact power-of-two scale suffices.
    scale = float(2 ** (NUM_SEQUENCES + 1))
    w_flat = weights.reshape(NUM_OPS, 9).astype(jnp.float32)
    w_flat = w_flat.at[0].multiply(scale)

    path = force_path or _pick_path(L)

    # Block / grid selection.  Grid is over batch-row groups only.
    num_rows = -(-N // pack)
    gb, rows_pad = _choose_block_rows(num_rows, L * itemsize)
    total_imgs = rows_pad * pack
    x_flat = x_nchw.reshape(N, hw)
    if total_imgs != N:                # zero-pad the batch; dropped after the call
        x_flat = jnp.pad(x_flat, ((0, total_imgs - N), (0, 0)))
    xg = x_flat.reshape(rows_pad, L)
    grid = (rows_pad // gb,)
    # TODO(synk): H-tiled (row-band + halo) fallback for images so large that even
    # an 8-row block exceeds the VMEM budget (e.g. f32 1k x 1k on v7x).

    # Realistic VMEM accounting: double-buffered in/out blocks + in-kernel f32
    # temporaries (+ the flat-conv matrix on the MXU path).
    block_in = gb * L * itemsize
    block_f32 = gb * L * 4
    if path == "mxu":
        vmem_need = 8 * block_in + 4 * block_f32 + 2 * (L * L * 4) + 2 * _MiB
    else:
        vmem_need = 8 * block_in + 12 * block_f32 + 2 * _MiB
    vmem_limit = int(min(max(vmem_need, 32 * _MiB), 64 * _MiB))
    compiler_params = pltpu.CompilerParams(
        dimension_semantics=("parallel",), vmem_limit_bytes=vmem_limit)
    out_shape = jax.ShapeDtypeStruct((rows_pad, L), dtype)

    if path == "mxu":
        m = _flat_conv_matrix(w_flat, H, W, pack)
        out = pl.pallas_call(
            _conv_seq_mxu_kernel,
            out_shape=out_shape,
            grid_spec=pltpu.PrefetchScalarGridSpec(
                num_scalar_prefetch=0,
                grid=grid,
                in_specs=[pl.BlockSpec((gb, L), lambda g: (g, 0)),
                          pl.BlockSpec((L, L), lambda g: (0, 0))],
                out_specs=pl.BlockSpec((gb, L), lambda g: (g, 0))),
            compiler_params=compiler_params,
        )(xg, m)
    else:
        kernel = functools.partial(_conv_seq_vpu_kernel, img_h=H, img_w=W)
        out = pl.pallas_call(
            kernel,
            out_shape=out_shape,
            grid_spec=pltpu.PrefetchScalarGridSpec(
                num_scalar_prefetch=1,              # (NUM_OPS, 9) table -> SMEM
                grid=grid,
                in_specs=[pl.BlockSpec((gb, L), lambda g, w_s: (g, 0))],
                out_specs=pl.BlockSpec((gb, L), lambda g, w_s: (g, 0))),
            compiler_params=compiler_params,
        )(w_flat, xg)

    out = out.reshape(total_imgs, hw)[:N]
    return out.reshape(N, 1, H, W)


# --------------------------------------------------------------------------- #
# Pure-JAX reference (mirrors the PyTorch forward)
# --------------------------------------------------------------------------- #
def _reference(x_nchw, weights):
    x = x_nchw.astype(jnp.float32)
    op_idx = 0
    for _seq in range(NUM_SEQUENCES):
        for _op in range(OPS_PER_SEQUENCE):
            w = weights[op_idx].reshape(1, 1, 3, 3).astype(jnp.float32)  # OIHW
            x = jax.lax.conv_general_dilated(
                x, w, window_strides=(1, 1), padding=((1, 1), (1, 1)),
                dimension_numbers=("NCHW", "OIHW", "NCHW"),
                precision=jax.lax.Precision.HIGHEST)
            op_idx += 1
        x = x + x
    return (x + x).astype(x_nchw.dtype)


if __name__ == "__main__":
    key = jax.random.PRNGKey(0)
    kx, kw = jax.random.split(key)

    # Conv2d default init bound: fan_in = 1 * 3 * 3 = 9 -> bound = 1/3.
    bound = 1.0 / 3.0
    weights = jax.random.uniform(
        kw, (NUM_OPS, 3, 3), dtype=jnp.float32, minval=-bound, maxval=bound)

    # Small NCHW input (C must be 1 for this module).  16 images of 16x16 give a
    # 256-wide lane-dense flat layout and a 2-step "parallel" grid.
    x = jax.random.normal(kx, (16, 1, 16, 16), dtype=jnp.float32)

    ref = jax.block_until_ready(_reference(x, weights))

    # Auto path: MXU flat-conv matrix on v6e/v7x, roll/mask VPU path on v5e.
    out = jax.block_until_ready(op_sequences_add_conv2d(x, weights))
    assert out.shape == ref.shape and out.dtype == ref.dtype
    np.testing.assert_allclose(np.asarray(out), np.asarray(ref),
                               rtol=1e-4, atol=1e-5)

    # The VPU/XLU path is the fallback for v5e and large images; validate it too.
    out_vpu = jax.block_until_ready(
        op_sequences_add_conv2d(x, weights, force_path="vpu"))
    np.testing.assert_allclose(np.asarray(out_vpu), np.asarray(ref),
                               rtol=1e-4, atol=1e-5)

    print("KERNEL_OK")
</pallas_src>

<mosaic_0001>
module attributes {stable_mosaic.version = 11 : i64} {
  func.func @_conv_seq_mxu_kernel(%arg0: i32, %arg1: memref<8x256xf32, #tpu.memory_space<vmem>>, %arg2: memref<256x256xf32, #tpu.memory_space<vmem>>, %arg3: memref<8x256xf32, #tpu.memory_space<vmem>>) attributes {dimension_semantics = [#tpu.dimension_semantics<parallel>], iteration_bounds = array<i64: 2>, scalar_prefetch = 0 : i64, scratch_operands = 0 : i64, tpu.core_type = #tpu.core_type<tc>, window_params = [{transform_indices = @transform_0, window_bounds = array<i64: 8, 256>}, {pipeline_mode = #tpu.pipeline_mode<synchronous>, transform_indices = @transform_1, window_bounds = array<i64: 256, 256>}, {transform_indices = @transform_2, window_bounds = array<i64: 8, 256>}]} {
    %c0 = arith.constant 0 : index
    %c0_0 = arith.constant 0 : index
    %0 = vector.load %arg1[%c0, %c0_0] : memref<8x256xf32, #tpu.memory_space<vmem>>, vector<8x256xf32>
    %c0_1 = arith.constant 0 : index
    %c0_2 = arith.constant 0 : index
    %1 = vector.load %arg2[%c0_1, %c0_2] : memref<256x256xf32, #tpu.memory_space<vmem>>, vector<256x256xf32>
    %cst = arith.constant dense<0.000000e+00> : vector<8x256xf32>
    %2 = tpu.matmul %0, %1, %cst {dimension_numbers = #tpu.dot_dimension_numbers<[1], [0], [0], [1], [0, 0, 1, 1], [], []>, precision = #tpu.contract_precision<fp32>} : vector<8x256xf32>, vector<256x256xf32>, vector<8x256xf32> -> vector<8x256xf32>
    %c0_3 = arith.constant 0 : index
    %c0_4 = arith.constant 0 : index
    %3 = vector.load %arg3[%c0_3, %c0_4] : memref<8x256xf32, #tpu.memory_space<vmem>>, vector<8x256xf32>
    tpu.vector_store %arg3[%c0_3, %c0_4], %2 {strides = array<i32>} : memref<8x256xf32, #tpu.memory_space<vmem>>, vector<8x256xf32>,
    return
  }
  func.func @transform_0(%arg0: i32) -> (i32, i32) {
    %c0_i32 = arith.constant 0 : i32
    %c0_i32_0 = arith.constant 0 : i32
    return %arg0, %c0_i32 : i32, i32
  }
  func.func @transform_1(%arg0: i32) -> (i32, i32) {
    %c0_i32 = arith.constant 0 : i32
    %c0_i32_0 = arith.constant 0 : i32
    %c0_i32_1 = arith.constant 0 : i32
    return %c0_i32, %c0_i32_0 : i32, i32
  }
  func.func @transform_2(%arg0: i32) -> (i32, i32) {
    %c0_i32 = arith.constant 0 : i32
    %c0_i32_0 = arith.constant 0 : i32
    return %arg0, %c0_i32 : i32, i32
  }
}

</mosaic_0001>

<bundles_post_ra>
// kernel: tpu_custom_call.1
= control target key start
LH: loop header
LB: loop body
LE: loop exit
PB: predicated region body
PF: predicated region fallthrough
CT: control target
= control target key end

     0   :  { %7 = vsyncpa [#allocation3], 0  ;;  %s3198_s0 = inlined_call_operand.hbm [shape: f32[16,256], index: 0, kind: input, shape index: {}]   ;;  %s3199_s1 = inlined_call_operand.hbm [shape: f32[256,256], index: 1, kind: input, shape index: {}]   ;;  %s3200_s2 = inlined_call_operand.hbm [shape: f32[16,256], index: 2, kind: output, shape index: {}]  }
   0x1   :  { %9 = vsyncpa [#allocation3 + $0x1], 0 }
   0x2   :  { %10 = vsyncpa [#allocation6], 0 }
   0x3   :  { %11 = vsyncpa [#allocation4], 0 }
   0x4   :  { %13 = vsyncpa [#allocation4 + $0x1], 0  ;;  %s2243_s9 = smov 0   ;;  %s2245_s10 = smov 0  }
   0x5   :  { %s2247_s11 = smov 0   ;;  %s2249_s12 = smov 0  }
   0x6 LB: > { %s2264_s13 = sadd.s32 4294967295, %s2221_s12   ;;  %s1622_s14 = sadd.s32 4294967294, %s2221_s12   ;;  %s2221_s12 = sphi %s2249_s12, %s3638_s12   ;;  %s2217_s11 = sphi %s2247_s11, %s3637_s11   ;;  %s2213_s10 = sphi %s2245_s10, %s3636_s10   ;;  %s2209_s9 = sphi %s2243_s9, %s3635_s9  }
   0x7   : > { %p39_p0 = scmp.ne.s32.totalorder %s2213_s10, %s2209_s9  ;;  %p3201_p1 = scmp.eq.s32.totalorder %s2264_s13, 0 }
   0x8   : > { %p90_p3 = scmp.eq.s32.totalorder %s1622_s14, 1  ;;  %p1623_p5 = scmp.ge.s32.totalorder %s2221_s12, 1 }
   0x9   : > { %p2273_p4 = por %p3201_p1, %p39_p0  ;;  %p97_p7 = scmp.lt.s32.totalorder %s2221_s12, 3 }
   0xa   : > { %p2278_p6 = por %p90_p3, %p39_p0  ;;  %s2223_s18 = smov [#allocation5]  }
   0xb   : > { %s3350_s15 = scalar_select %p2273_p4, 1, 0 }
   0xc   : > { %s3351_s16 = scalar_select %p2278_p6, 1, 0 }
   0xd   : > { %p2283_p8 = pnand %p1623_p5, %p97_p7  ;;  %s109_s19 = sshll.u32 %s2223_s18, 4  ;;  %s2287_s19 = int_to_ptr.vmem [resolvable:$true] %s109_s19 }
   0xe   : > { %s2299_s21 = sadd.s32 1, %s2221_s12   ;;  %s26_s22 = sadd.s32 1, %s2217_s11 }
   0xf   : > { %s3352_s17 = scalar_select %p2283_p8, 1, 0 }
  0x10   : > { %p2042_p9 = pneg %p2283_p8  ;;  %s23_s23 = ssub.s32 %s2221_s12, %s2299_s21 }
  0x11   : > { %s2093_s26 = scalar_lea.hbm %s3199_s1, 8192 }
  0x12   : > { %p2294_p11 = pnand %p2042_p9, %p3201_p1  ;;  %p2094_p12 = scmp.ne.s32.totalorder %s3199_s1, %s2093_s26 }
  0x13   : > { %p2100_p5 = scmp.lt.u32.totalorder %s2093_s26, %s3199_s1 }
  0x14   : > { %p2095_p13 = pneg %p2294_p11 }
  0x16   : > { %p2096_p0 = pnand %p2095_p13, %p2094_p12 }
  0x18   : > { %p2097_p3 = pneg %p2096_p0 }
  0x1a   : > { %p2102_p7 = pnand %p2100_p5, %p2097_p3 }
  0x1c   : > { %2105 = shalt.err (!%p2102_p7)
}
  0x1d   : > { %s2106_s3 = scalar_lea.vmem %s2287_s19, 8192  ;;  %p2114_p2 = scmp.lt.s32.totalorder %s2287_s19, %s2287_s19 }
  0x1e   : > { %p2107_p9 = scmp.ne.s32.totalorder %s2287_s19, %s2106_s3  ;;  %p2115_p6 = scmp.lt.s32.totalorder %s2106_s3, %s2106_s3 }
  0x20   : > { %p2109_p10 = pnand %p2107_p9, %p2095_p13  ;;  %p2116_p4 = por %p2115_p6, %p2114_p2 }
  0x22   : > { %p2110_p1 = pneg %p2109_p10 }
  0x24   : > { %p2117_p8 = pnand %p2116_p4, %p2110_p1 }
  0x26   : > { %2120 = shalt.err (!%p2117_p8)
}
  0x27   : > { %s2224_s4 = smov 256   ;;  %s2225_s5 = smov 16  }
  0x28   : > { %2045 = dma.hbm_to_vmem [thread:$0]  (!%p2294_p11), %s3199_s1, 8192, %s2287_s19, [#allocation6], %s2224_s4, %s2224_s4, %s2225_s5  }
  0x29   : > { %p24_p2 = scmp.eq.s32.totalorder %s23_s23, 0  ;;  %p33_p1 = scmp.ne.s32.totalorder %s2217_s11, %s2213_s10 }
  0x2a   : > { %p34_p4 = scmp.eq.s32.totalorder %s2221_s12, 0  ;;  %p2055_p6 = scmp.lt.s32.totalorder %s2221_s12, 2 }
  0x2b   : > { %s2330_s8 = scalar_select %p24_p2, %s2217_s11, %s26_s22  }
  0x2c   : > { %p35_p8 = por %p34_p4, %p33_p1  ;;  %p3354_p10 = scmp.eq.s32.totalorder %s2264_s13, 1 }
  0x2d   : > { %s123_s18 = sand.u32 1, %s2217_s11   ;;  %s1638_s24 = sshll.u32 %s2221_s12, 8 }
  0x2e   : > { %p2334_p12 = por %p3354_p10, %p33_p1  ;;  %s1626_s25 = sshll.u32 %s123_s18, 4 }
  0x2f   : > { %s2343_s27 = scalar_lea.hbm %s3198_s0, %s1638_s24  ;;  %s127_s19 = scalar_lea.vmem [#allocation2], %s1626_s25 }
  0x30   : > { %s135_s22 = sshll.u32 %s127_s19, 4  ;;  %p2345_p11 = pnand %p2055_p6, %p35_p8  ;;  %s2349_s22 = int_to_ptr.vmem [resolvable:$true] %s135_s22 }
  0x31   : > { %s124_s28 = scalar_lea.sflag [#allocation3], %s123_s18  ;;  %s2121_s29 = scalar_lea.hbm %s2343_s27, 256 }
  0x32   : > { %p2122_p13 = scmp.ne.s32.totalorder %s2343_s27, %s2121_s29  ;;  %p2123_p0 = pneg %p2345_p11 }
  0x33   : > { %s2126_s4 = scalar_lea.hbm %s3198_s0, 512  ;;  %p2127_p7 = scmp.lt.u32.totalorder %s2343_s27, %s3198_s0 }
  0x34   : > { %p2124_p3 = pnand %p2123_p0, %p2122_p13  ;;  %p2128_p9 = scmp.lt.u32.totalorder %s2126_s4, %s2121_s29 }
  0x35   : > { %p2130_p1 = scmp.lt.u32.totalorder %s2121_s29, %s2343_s27 }
  0x36   : > { %p2125_p5 = pneg %p2124_p3  ;;  %p2129_p2 = por %p2128_p9, %p2127_p7 }
  0x38   : > { %p2131_p4 = por %p2130_p1, %p2129_p2 }
  0x3a   : > { %p2132_p6 = pnand %p2131_p4, %p2125_p5 }
  0x3c   : > { %2135 = shalt.err (!%p2132_p6)
}
  0x3d   : > { %s2136_s7 = scalar_lea.vmem %s2349_s22, 256  ;;  %s2226_s18 = smov [#allocation2]  }
  0x3e   : > { %p2137_p8 = scmp.ne.s32.totalorder %s2349_s22, %s2136_s7  ;;  %s2141_s24 = sshll.u32 %s2226_s18, 4  ;;  %s2142_s24 = int_to_ptr.vmem [resolvable:$false] %s2141_s24 }
  0x3f   : > { %s2143_s25 = scalar_lea.vmem %s2142_s24, 512  ;;  %p2144_p3 = scmp.lt.s32.totalorder %s2349_s22, %s2142_s24 }
  0x40   : > { %p2139_p10 = pnand %p2137_p8, %p2123_p0  ;;  %p2145_p7 = scmp.lt.s32.totalorder %s2143_s25, %s2136_s7 }
  0x42   : > { %p2140_p13 = pneg %p2139_p10  ;;  %p2146_p9 = por %p2145_p7, %p2144_p3 }
  0x44   : > { %p2147_p2 = pnand %p2146_p9, %p2140_p13 }
  0x46   : > { %2150 = shalt.err (!%p2147_p2)
}
  0x47   : > { %2049 = dma.hbm_to_vmem [thread:$0]  (!%p2345_p11), %s2343_s27, 256, %s2349_s22, %s124_s28  }
  0x48   : > { %p3357_p5 = scmp.ne.s32.totalorder %s3352_s17, 0 }
  0x4a   : > { %144 = sbr.rel (%p3357_p5) target bundleno = 515 (0x203), region = 28 }
  0x51   : > { %s2379_s20 = sand.u32 1, %s2213_s10   ;;  %p3358_p0 = scmp.ne.s32.totalorder %s3350_s15, 0 }
  0x52   : > { %s1630_s26 = sshll.u32 %s2379_s20, 4  ;;  %s147_s19 = scalar_lea.sflag [#allocation3], %s2379_s20 }
  0x53   : > { %s2385_s29 = scalar_lea.vmem [#allocation2], %s1630_s26 }
  0x54   : > { %2196 = dma.done.wait (%p3358_p0), %s147_s19, 256  }
  0x55   : > { %2198 = vsyncadd (%p3358_p0), %s147_s19, 4294967040  ;;  %p3359_p11 = scmp.eq.s32.totalorder %s2264_s13, 0 }
  0x57   : > { %2200 = dma.done.wait (%p3359_p11), [#allocation6], 8192   ;;  %p3360_p1 = pmov %p3359_p11 }
  0x58   : > { %v178_v0 = vld [vmem:[#allocation5 + $0x8] sm:$0xff]  ;;  %v180_v1 = vld [vmem:[#allocation5 + $0x18] sm:$0xff]  ;;  %v177_v2 = vld [vmem:[#allocation5] sm:$0xff]  ;;  %s1639_s15 = sshll.u32 %s2264_s13, 8  ;;  %s174_s17 = scalar_lea.vmem [#allocation7], %s1630_s26 }
  0x59   : > { %2202 = vsyncadd (%p3360_p1), [#allocation6], 4294959104  ;;  %v241_v3 = vand.u32 4294901760, %v178_v0  ;;  %v245_v4 = vand.u32 4294901760, %v180_v1  ;;  %v179_v5 = vld [vmem:[#allocation5 + $0x10] sm:$0xff]  ;;  %v243_v6 = vand.u32 4294901760, %v177_v2  ;;  %s3154_s28 = scalar_lea.hbm %s3200_s2, %s1639_s15 }
  0x5a   : > { %v182_v7 = vld [vmem:[#allocation5 + $0x28] sm:$0xff]  ;;  %v184_v8 = vld [vmem:[#allocation5 + $0x38] sm:$0xff]  ;;  %v247_v9 = vand.u32 4294901760, %v179_v5  ;;  %v181_v12 = vld [vmem:[#allocation5 + $0x20] sm:$0xff]  ;;  %s1542_s27 = sshll.u32 %s174_s17, 4  ;;  %s1528_s13 = scalar_lea.sflag [#allocation4], %s2379_s20  ;;  %s3156_s27 = int_to_ptr.vmem [resolvable:$true] %s1542_s27 }
  0x5b   : > { %v249_v10 = vand.u32 4294901760, %v182_v7  ;;  %v253_v11 = vand.u32 4294901760, %v184_v8  ;;  %v183_v13 = vld [vmem:[#allocation5 + $0x30] sm:$0xff]  ;;  %v186_v14 = vld [vmem:[#allocation5 + $0x48] sm:$0xff]  ;;  %v2395_v15 = vpack.c.bf16 %v245_v4, %v241_v3  ;;  %v2397_v16 = vld [vmem:[#allocation5 + $0x58] sm:$0xff]  ;;  %v251_v23 = vand.u32 4294901760, %v181_v12 }
  0x5c   : > { %v2399_v17 = vld [vmem:[#allocation5 + $0x40] sm:$0xff]  ;;  %v2401_v18 = vld [vmem:[#allocation5 + $0x50] sm:$0xff]  ;;  %v2403_v19 = vpack.c.bf16 %v247_v9, %v243_v6  ;;  %v190_v21 = vld [vmem:[#allocation5 + $0x68] sm:$0xff]  ;;  %v255_v24 = vand.u32 4294901760, %v183_v13  ;;  %v257_v25 = vand.u32 4294901760, %v186_v14  ;;  %v261_v26 = vand.u32 4294901760, %v2397_v16 }
  0x5d   : > { %3361 = vst [vmem:[#allocation11_spill] sm:$0xff] %v2395_v15  ;;  %v2405_v20 = vpack.c.bf16 %v253_v11, %v249_v10  ;;  %v192_v22 = vld [vmem:[#allocation5 + $0x78] sm:$0xff]  ;;  %1641 = vmatprep.subr.bf16.mxu1 %v2395_v15  ;;  %1833 = vmatprep.subr.bf16.mxu0 %v2395_v15  ;;  %v259_v27 = vand.u32 4294901760, %v2399_v17  ;;  %v263_v28 = vand.u32 4294901760, %v2401_v18  ;;  %v265_v30 = vand.u32 4294901760, %v190_v21  ;;  %v189_v32 = vld [vmem:[#allocation5 + $0x60] sm:$0xff] }
  0x5e   : > { %3362 = vst [vmem:[#allocation12_spill] sm:$0xff] %v2403_v19  ;;  %1643 = vmatpush1.bf16.msra.mxu1 %v2403_v19  ;;  %1835 = vmatpush1.bf16.msra.mxu0 %v2403_v19  ;;  %v2416_v29 = vpack.c.bf16 %v255_v24, %v251_v23  ;;  %v269_v31 = vand.u32 4294901760, %v192_v22  ;;  %v191_v33 = vld [vmem:[#allocation5 + $0x70] sm:$0xff]  ;;  %v2418_v34 = vpack.c.bf16 %v261_v26, %v257_v25  ;;  %v194_v35 = vld [vmem:[#allocation5 + $0x88] sm:$0xff]  ;;  %v196_v36 = vld [vmem:[#allocation5 + $0x98] sm:$0xff]  ;;  %v267_v38 = vand.u32 4294901760, %v189_v32 }
  0x5f   : > { %3363 = vst [vmem:[#allocation13_spill] sm:$0xff] %v2405_v20  ;;  %1645 = vmatprep.subr.bf16.mxu1 %v2405_v20  ;;  %1837 = vmatprep.subr.bf16.mxu0 %v2405_v20  ;;  %v2422_v37 = vpack.c.bf16 %v263_v28, %v259_v27  ;;  %v271_v39 = vand.u32 4294901760, %v191_v33  ;;  %v273_v41 = vand.u32 4294901760, %v194_v35  ;;  %v277_v42 = vand.u32 4294901760, %v196_v36  ;;  %v193_v43 = vld [vmem:[#allocation5 + $0x80] sm:$0xff]  ;;  %v195_v44 = vld [vmem:[#allocation5 + $0x90] sm:$0xff] }
  0x60   : > { %3364 = vst [vmem:[#allocation14_spill] sm:$0xff] %v2416_v29  ;;  %3365 = vst [vmem:[#allocation15_spill] sm:$0xff] %v2418_v34  ;;  %v2426_v40 = vpack.c.bf16 %v269_v31, %v265_v30  ;;  %v2428_v45 = vsub.f32 %v178_v0, %v241_v3  ;;  %v2430_v46 = vsub.f32 %v180_v1, %v245_v4  ;;  %v198_v48 = vld [vmem:[#allocation5 + $0xa8] sm:$0xff]  ;;  %v200_v49 = vld [vmem:[#allocation5 + $0xb8] sm:$0xff]  ;;  %v275_v56 = vand.u32 4294901760, %v193_v43  ;;  %s2151_s30 = scalar_lea.vmem %s3156_s27, 256 }
  0x61   : > { %3366 = vst [vmem:[#allocation16_spill] sm:$0xff] %v2422_v37  ;;  %v2432_v47 = vsub.f32 %v177_v2, %v243_v6  ;;  %v2434_v50 = vsub.f32 %v179_v5, %v247_v9  ;;  %v2436_v51 = vsub.f32 %v182_v7, %v249_v10  ;;  %v2438_v52 = vsub.f32 %v184_v8, %v253_v11  ;;  %v197_v58 = vld [vmem:[#allocation5 + $0xa0] sm:$0xff]  ;;  %v199_v59 = vld [vmem:[#allocation5 + $0xb0] sm:$0xff]  ;;  %v202_v0 = vld [vmem:[#allocation5 + $0xc8] sm:$0xff]  ;;  %p2152_p4 = scmp.ne.s32.totalorder %s3156_s27, %s2151_s30  ;;  %s2227_s3 = smov [#allocation7]  }
  0x62   : > { %1647 = vmatpush1.bf16.msra.mxu1 %v2416_v29  ;;  %1839 = vmatpush1.bf16.msra.mxu0 %v2416_v29  ;;  %3367 = vst [vmem:[#allocation17_spill] sm:$0xff] %v2426_v40  ;;  %3368 = vst [vmem:[#allocation18_spill] sm:$0xff] %v2428_v45  ;;  %v2440_v53 = vsub.f32 %v181_v12, %v251_v23  ;;  %v2442_v54 = vsub.f32 %v183_v13, %v255_v24  ;;  %v279_v57 = vand.u32 4294901760, %v195_v44  ;;  %v204_v1 = vld [vmem:[#allocation5 + $0xd8] sm:$0xff]  ;;  %v201_v10 = vld [vmem:[#allocation5 + $0xc0] sm:$0xff]  ;;  %s2155_s4 = sshll.u32 %s2227_s3, 4  ;;  %s2156_s4 = int_to_ptr.vmem [resolvable:$false] %s2155_s4 }
  0x63   : > { %1649 = vmatprep.subr.bf16.mxu1 %v2418_v34  ;;  %1841 = vmatprep.subr.bf16.mxu0 %v2418_v34  ;;  %3369 = vst [vmem:[#allocation19_spill] sm:$0xff] %v2430_v46  ;;  %3370 = vst [vmem:[#allocation20_spill] sm:$0xff] %v2432_v47  ;;  %v2446_v55 = vpack.c.bf16 %v271_v39, %v267_v38  ;;  %v2448_v60 = vsub.f32 %v186_v14, %v257_v25  ;;  %v281_v62 = vand.u32 4294901760, %v198_v48  ;;  %v203_v11 = vld [vmem:[#allocation5 + $0xd0] sm:$0xff]  ;;  %v208_v23 = vld [vmem:[#allocation5 + $0xf8] sm:$0xff]  ;;  %p2153_p6 = pnand %p2152_p4, %p2334_p12  ;;  %s2157_s5 = scalar_lea.vmem %s2156_s4, 512 }
  0x64   : > { %3371 = vst [vmem:[#allocation21_spill] sm:$0xff] %v2434_v50  ;;  %3372 = vst [vmem:[#allocation22_spill] sm:$0xff] %v2436_v51  ;;  %v2452_v61 = vpack.c.bf16 %v277_v42, %v273_v41  ;;  %v285_v63 = vand.u32 4294901760, %v200_v49  ;;  %v2455_v2 = vsub.f32 %v2397_v16, %v261_v26  ;;  %v2458_v3 = vsub.f32 %v2399_v17, %v259_v27  ;;  %v220_v34 = vld [vmem:[#allocation5 + $0x158] sm:$0xff]  ;;  %v217_v20 = vld [vmem:[#allocation5 + $0x140] sm:$0xff]  ;;  %p2158_p10 = scmp.lt.s32.totalorder %s3156_s27, %s2156_s4  ;;  %p2159_p13 = scmp.lt.s32.totalorder %s2157_s5, %s2151_s30 }
  0x65   : > { %3373 = vst [vmem:[#allocation23_spill] sm:$0xff] %v2438_v52  ;;  %3374 = vst [vmem:[#allocation24_spill] sm:$0xff] %v2446_v55  ;;  %v2461_v4 = vsub.f32 %v2401_v18, %v263_v28  ;;  %v2463_v5 = vsub.f32 %v190_v21, %v265_v30  ;;  %v2465_v6 = vsub.f32 %v192_v22, %v269_v31  ;;  %v283_v8 = vand.u32 4294901760, %v197_v58  ;;  %v206_v22 = vld [vmem:[#allocation5 + $0xe8] sm:$0xff]  ;;  %v205_v28 = vld [vmem:[#allocation5 + $0xe0] sm:$0xff]  ;;  %p2154_p8 = pneg %p2153_p6 }
  0x66   : > { %1651 = vmatpush1.bf16.msra.mxu1 %v2422_v37  ;;  %1843 = vmatpush1.bf16.msra.mxu0 %v2422_v37  ;;  %3375 = vst [vmem:[#allocation25_spill] sm:$0xff] %v2452_v61  ;;  %3376 = vst [vmem:[#allocation26_spill] sm:$0xff] %v2458_v3  ;;  %v2467_v7 = vsub.f32 %v189_v32, %v267_v38  ;;  %v287_v9 = vand.u32 4294901760, %v199_v59  ;;  %v2470_v12 = vsub.f32 %v191_v33, %v271_v39  ;;  %v207_v30 = vld [vmem:[#allocation5 + $0xf0] sm:$0xff]  ;;  %v212_v38 = vld [vmem:[#allocation5 + $0x118] sm:$0xff]  ;;  %p2160_p3 = por %p2159_p13, %p2158_p10 }
  0x67   : > { %1653 = vmatprep.subr.bf16.mxu1 %v2426_v40  ;;  %1845 = vmatprep.subr.bf16.mxu0 %v2426_v40  ;;  %3377 = vst [vmem:[#allocation27_spill] sm:$0xff] %v2461_v4  ;;  %3378 = vst [vmem:[#allocation28_spill] sm:$0xff] %v2463_v5  ;;  %v2473_v13 = vpack.c.bf16 %v279_v57, %v275_v56  ;;  %v289_v14 = vand.u32 4294901760, %v202_v0  ;;  %v293_v16 = vand.u32 4294901760, %v204_v1  ;;  %v291_v26 = vand.u32 4294901760, %v201_v10 }
  0x68   : > { %3379 = vst [vmem:[#allocation29_spill] sm:$0xff] %v2467_v7  ;;  %3380 = vst [vmem:[#allocation30_spill] sm:$0xff] %v2470_v12  ;;  %v2476_v17 = vsub.f32 %v194_v35, %v273_v41  ;;  %v2478_v18 = vsub.f32 %v196_v36, %v277_v42  ;;  %v2481_v21 = vpack.c.bf16 %v285_v63, %v281_v62  ;;  %v295_v27 = vand.u32 4294901760, %v203_v11  ;;  %v210_v36 = vld [vmem:[#allocation5 + $0x108] sm:$0xff]  ;;  %p2161_p7 = pnand %p2160_p3, %p2154_p8 }
  0x69   : > { %3381 = vst [vmem:[#allocation31_spill] sm:$0xff] %v2473_v13  ;;  %v2483_v24 = vsub.f32 %v193_v43, %v275_v56  ;;  %v2485_v25 = vsub.f32 %v195_v44, %v279_v57  ;;  %v2487_v31 = vsub.f32 %v198_v48, %v281_v62  ;;  %v2489_v32 = vsub.f32 %v200_v49, %v285_v63  ;;  %v209_v44 = vld [vmem:[#allocation5 + $0x100] sm:$0xff]  ;;  %v211_v48 = vld [vmem:[#allocation5 + $0x110] sm:$0xff]  ;;  %v214_v62 = vld [vmem:[#allocation5 + $0x128] sm:$0xff] }
  0x6a   : > { %1655 = vmatpush1.bf16.msra.mxu1 %v2446_v55  ;;  %1847 = vmatpush1.bf16.msra.mxu0 %v2446_v55  ;;  %3382 = vst [vmem:[#allocation32_spill] sm:$0xff] %v2476_v17  ;;  %3383 = vst [vmem:[#allocation33_spill] sm:$0xff] %v2478_v18  ;;  %v2491_v33 = vpack.c.bf16 %v287_v9, %v283_v8  ;;  %v2493_v35 = vsub.f32 %v197_v58, %v283_v8  ;;  %v297_v42 = vand.u32 4294901760, %v206_v22  ;;  %v216_v63 = vld [vmem:[#allocation5 + $0x138] sm:$0xff]  ;;  %v215_v55 = vld [vmem:[#allocation5 + $0x130] sm:$0xff] }
  0x6b   : > { %1657 = vmatprep.subr.bf16.mxu1 %v2452_v61  ;;  %1849 = vmatprep.subr.bf16.mxu0 %v2452_v61  ;;  %3384 = vst [vmem:[#allocation34_spill] sm:$0xff] %v2481_v21  ;;  %3385 = vst [vmem:[#allocation35_spill] sm:$0xff] %v2483_v24  ;;  %v2497_v39 = vsub.f32 %v199_v59, %v287_v9  ;;  %v2499_v41 = vpack.c.bf16 %v293_v16, %v289_v14  ;;  %v301_v43 = vand.u32 4294901760, %v208_v23  ;;  %v213_v61 = vld [vmem:[#allocation5 + $0x120] sm:$0xff] }
  0x6c   : > { %3386 = vst [vmem:[#allocation36_spill] sm:$0xff] %v2485_v25  ;;  %3387 = vst [vmem:[#allocation37_spill] sm:$0xff] %v2487_v31  ;;  %v2503_v49 = vsub.f32 %v202_v0, %v289_v14  ;;  %v2505_v56 = vsub.f32 %v204_v1, %v293_v16  ;;  %v299_v57 = vand.u32 4294901760, %v205_v28  ;;  %v303_v58 = vand.u32 4294901760, %v207_v30 }
  0x6d   : > { %3388 = vst [vmem:[#allocation38_spill] sm:$0xff] %v2489_v32  ;;  %3389 = vst [vmem:[#allocation39_spill] sm:$0xff] %v2491_v33  ;;  %v2507_v59 = vpack.c.bf16 %v295_v27, %v291_v26  ;;  %v2509_v8 = vsub.f32 %v201_v10, %v291_v26  ;;  %v305_v9 = vand.u32 4294901760, %v210_v36  ;;  %v2511_v40 = vsub.f32 %v203_v11, %v295_v27 }
  0x6e   : > { %3390 = vst [vmem:[#allocation40_spill] sm:$0xff] %v2493_v35  ;;  %1659 = vmatpush1.bf16.msra.mxu1 %v2473_v13  ;;  %1851 = vmatpush1.bf16.msra.mxu0 %v2473_v13  ;;  %3391 = vst [vmem:[#allocation41_spill] sm:$0xff] %v2497_v39  ;;  %v309_v13 = vand.u32 4294901760, %v212_v38  ;;  %v2513_v37 = vsub.f32 %v206_v22, %v297_v42  ;;  %v307_v0 = vand.u32 4294901760, %v209_v44  ;;  %v311_v14 = vand.u32 4294901760, %v211_v48 }
  0x6f   : > { %3392 = vst [vmem:[#allocation42_spill] sm:$0xff] %v2499_v41  ;;  %1661 = vmatprep.subr.bf16.mxu1 %v2481_v21  ;;  %1853 = vmatprep.subr.bf16.mxu0 %v2481_v21  ;;  %3393 = vst [vmem:[#allocation43_spill] sm:$0xff] %v2503_v49  ;;  %v2517_v1 = vpack.c.bf16 %v301_v43, %v297_v42  ;;  %v2519_v16 = vsub.f32 %v208_v23, %v301_v43  ;;  %v313_v10 = vand.u32 4294901760, %v214_v62  ;;  %v218_v21 = vld [vmem:[#allocation5 + $0x148] sm:$0xff] }
  0x70   : > { %3394 = vst [vmem:[#allocation44_spill] sm:$0xff] %v2505_v56  ;;  %3395 = vst [vmem:[#allocation45_spill] sm:$0xff] %v2507_v59  ;;  %v317_v26 = vand.u32 4294901760, %v216_v63  ;;  %v2523_v11 = vpack.c.bf16 %v303_v58, %v299_v57  ;;  %v2525_v22 = vsub.f32 %v205_v28, %v299_v57  ;;  %v315_v27 = vand.u32 4294901760, %v213_v61  ;;  %v222_v28 = vld [vmem:[#allocation5 + $0x168] sm:$0xff]  ;;  %v224_v57 = vld [vmem:[#allocation5 + $0x178] sm:$0xff] }
  0x71   : > { %3396 = vst [vmem:[#allocation46_spill] sm:$0xff] %v2509_v8  ;;  %3397 = vst [vmem:[#allocation47_spill] sm:$0xff] %v2511_v40  ;;  %v319_v29 = vand.u32 4294901760, %v215_v55  ;;  %v2527_v42 = vsub.f32 %v207_v30, %v303_v58  ;;  %v2529_v23 = vpack.c.bf16 %v309_v13, %v305_v9  ;;  %v2531_v43 = vsub.f32 %v210_v36, %v305_v9 }
  0x72   : > { %3398 = vst [vmem:[#allocation48_spill] sm:$0xff] %v2513_v37  ;;  %1663 = vmatpush1.bf16.msra.mxu1 %v2491_v33  ;;  %1855 = vmatpush1.bf16.msra.mxu0 %v2491_v33  ;;  %3399 = vst [vmem:[#allocation49_spill] sm:$0xff] %v2517_v1  ;;  %v219_v33 = vld [vmem:[#allocation5 + $0x150] sm:$0xff]  ;;  %v2533_v19 = vsub.f32 %v212_v38, %v309_v13  ;;  %v2535_v15 = vpack.c.bf16 %v311_v14, %v307_v0  ;;  %v325_v37 = vand.u32 4294901760, %v220_v34  ;;  %v221_v13 = vld [vmem:[#allocation5 + $0x160] sm:$0xff] }
  0x73   : > { %3400 = vst [vmem:[#allocation50_spill] sm:$0xff] %v2519_v16  ;;  %1665 = vmatprep.subr.bf16.mxu1 %v2499_v41  ;;  %1857 = vmatprep.subr.bf16.mxu0 %v2499_v41  ;;  %3401 = vst [vmem:[#allocation51_spill] sm:$0xff] %v2523_v11  ;;  %v2537_v16 = vsub.f32 %v209_v44, %v307_v0  ;;  %v321_v41 = vand.u32 4294901760, %v218_v21  ;;  %v2541_v30 = vsub.f32 %v211_v48, %v311_v14  ;;  %v223_v38 = vld [vmem:[#allocation5 + $0x170] sm:$0xff] }
  0x74   : > { %3402 = vst [vmem:[#allocation52_spill] sm:$0xff] %v2525_v22  ;;  %3403 = vst [vmem:[#allocation53_spill] sm:$0xff] %v2527_v42  ;;  %v2543_v58 = vpack.c.bf16 %v317_v26, %v313_v10  ;;  %v323_v36 = vand.u32 4294901760, %v217_v20  ;;  %v327_v9 = vand.u32 4294901760, %v219_v33  ;;  %v2547_v44 = vsub.f32 %v214_v62, %v313_v10  ;;  %v225_v42 = vld [vmem:[#allocation5 + $0x180] sm:$0xff]  ;;  %v227_v22 = vld [vmem:[#allocation5 + $0x190] sm:$0xff] }
  0x75   : > { %3404 = vst [vmem:[#allocation54_spill] sm:$0xff] %v2529_v23  ;;  %3405 = vst [vmem:[#allocation55_spill] sm:$0xff] %v2531_v43  ;;  %v2549_v0 = vsub.f32 %v216_v63, %v317_v26  ;;  %v2553_v48 = vsub.f32 %v213_v61, %v315_v27  ;;  %v2555_v14 = vsub.f32 %v215_v55, %v319_v29  ;;  %v333_v43 = vand.u32 4294901760, %v224_v57  ;;  %v230_v63 = vld [vmem:[#allocation5 + $0x1a8] sm:$0xff]  ;;  %v232_v26 = vld [vmem:[#allocation5 + $0x1b8] sm:$0xff] }
  0x76   : > { %3406 = vst [vmem:[#allocation56_spill] sm:$0xff] %v2533_v19  ;;  %3407 = vst [vmem:[#allocation57_spill] sm:$0xff] %v2535_v15  ;;  %1667 = vmatpush1.bf16.msra.mxu1 %v2507_v59  ;;  %1859 = vmatpush1.bf16.msra.mxu0 %v2507_v59  ;;  %v226_v19 = vld [vmem:[#allocation5 + $0x188] sm:$0xff]  ;;  %v228_v59 = vld [vmem:[#allocation5 + $0x198] sm:$0xff]  ;;  %v2557_v40 = vpack.c.bf16 %v325_v37, %v321_v41  ;;  %v2559_v8 = vsub.f32 %v218_v21, %v321_v41  ;;  %v331_v62 = vand.u32 4294901760, %v221_v13 }
  0x77   : > { %3408 = vst [vmem:[#allocation58_spill] sm:$0xff] %v2537_v16  ;;  %3409 = vst [vmem:[#allocation59_spill] sm:$0xff] %v2541_v30  ;;  %1669 = vmatprep.subr.bf16.mxu1 %v2517_v1  ;;  %1861 = vmatprep.subr.bf16.mxu0 %v2517_v1  ;;  %v2551_v16 = vpack.c.bf16 %v319_v29, %v315_v27  ;;  %v329_v30 = vand.u32 4294901760, %v222_v28  ;;  %v335_v10 = vand.u32 4294901760, %v223_v38  ;;  %v337_v55 = vand.u32 4294901760, %v226_v19 }
  0x78   : > { %3410 = vst [vmem:[#allocation60_spill] sm:$0xff] %v2543_v58  ;;  %3411 = vst [vmem:[#allocation61_spill] sm:$0xff] %v2547_v44  ;;  %v2563_v61 = vsub.f32 %v220_v34, %v325_v37  ;;  %v2565_v29 = vpack.c.bf16 %v327_v9, %v323_v36  ;;  %v341_v27 = vand.u32 4294901760, %v228_v59  ;;  %v2569_v21 = vsub.f32 %v217_v20, %v323_v36 }
  0x79   : > { %3412 = vst [vmem:[#allocation62_spill] sm:$0xff] %v2549_v0  ;;  %3413 = vst [vmem:[#allocation63_spill] sm:$0xff] %v2551_v16  ;;  %v2571_v41 = vsub.f32 %v219_v33, %v327_v9  ;;  %v339_v1 = vand.u32 4294901760, %v225_v42  ;;  %v345_v34 = vand.u32 4294901760, %v230_v63  ;;  %v349_v37 = vand.u32 4294901760, %v232_v26  ;;  %v176_v33 = vld [vmem:[%s2385_s29 + $0x8] sm:$0xff] }
  0x7a   : > { %3414 = vst [vmem:[#allocation64_spill] sm:$0xff] %v2553_v48  ;;  %3415 = vst [vmem:[#allocation65_spill] sm:$0xff] %v2555_v14  ;;  %1671 = vmatpush1.bf16.msra.mxu1 %v2523_v11  ;;  %1863 = vmatpush1.bf16.msra.mxu0 %v2523_v11  ;;  %v2573_v14 = vpack.c.bf16 %v333_v43, %v329_v30  ;;  %v2575_v11 = vsub.f32 %v222_v28, %v329_v30  ;;  %v231_v48 = vld [vmem:[#allocation5 + $0x1b0] sm:$0xff]  ;;  %v234_v9 = vld [vmem:[#allocation5 + $0x1c8] sm:$0xff] }
  0x7b   : > { %3416 = vst [vmem:[#allocation66_spill] sm:$0xff] %v2557_v40  ;;  %3417 = vst [vmem:[#allocation67_spill] sm:$0xff] %v2559_v8  ;;  %1673 = vmatprep.subr.bf16.mxu1 %v2529_v23  ;;  %1865 = vmatprep.subr.bf16.mxu0 %v2529_v23  ;;  %v343_v8 = vand.u32 4294901760, %v227_v22  ;;  %v2577_v0 = vsub.f32 %v224_v57, %v333_v43  ;;  %v2579_v44 = vpack.c.bf16 %v335_v10, %v331_v62  ;;  %v236_v43 = vld [vmem:[#allocation5 + $0x1d8] sm:$0xff]  ;;  %v175_v57 = vld [vmem:[%s2385_s29] sm:$0xff] }
  0x7c   : > { %3418 = vst [vmem:[#allocation68_spill] sm:$0xff] %v2563_v61  ;;  %3419 = vst [vmem:[#allocation69_spill] sm:$0xff] %v2565_v29  ;;  %v229_v61 = vld [vmem:[#allocation5 + $0x1a0] sm:$0xff]  ;;  %v2581_v23 = vsub.f32 %v221_v13, %v331_v62  ;;  %v2583_v20 = vsub.f32 %v223_v38, %v335_v10  ;;  %v2588_v28 = vpack.c.bf16 %v341_v27, %v337_v55  ;;  %v351_v10 = vand.u32 4294901760, %v231_v48 }
  0x7d   : > { %3420 = vst [vmem:[#allocation70_spill] sm:$0xff] %v2569_v21  ;;  %3421 = vst [vmem:[#allocation71_spill] sm:$0xff] %v2571_v41  ;;  %v2590_v30 = vsub.f32 %v226_v19, %v337_v55  ;;  %v2592_v36 = vsub.f32 %v228_v59, %v341_v27  ;;  %v2597_v13 = vpack.c.bf16 %v343_v8, %v339_v1  ;;  %v347_v62 = vand.u32 4294901760, %v229_v61 }
  0x7e   : > { %3422 = vst [vmem:[#allocation72_spill] sm:$0xff] %v2573_v14  ;;  %3423 = vst [vmem:[#allocation73_spill] sm:$0xff] %v2575_v11  ;;  %1675 = vmatpush1.bf16.msra.mxu1 %v2535_v15  ;;  %1867 = vmatpush1.bf16.msra.mxu0 %v2535_v15  ;;  %v2599_v38 = vsub.f32 %v225_v42, %v339_v1  ;;  %v233_v15 = vld [vmem:[#allocation5 + $0x1c0] sm:$0xff]  ;;  %v2603_v19 = vpack.c.bf16 %v349_v37, %v345_v34  ;;  %v2607_v55 = vand.u32 4294901760, %v176_v33  ;;  %v238_v42 = vld [vmem:[#allocation5 + $0x1e8] sm:$0xff] }
  0x7f   : > { %3424 = vst [vmem:[#allocation74_spill] sm:$0xff] %v2577_v0  ;;  %3425 = vst [vmem:[#allocation75_spill] sm:$0xff] %v2579_v44  ;;  %1677 = vmatprep.subr.bf16.mxu1 %v2543_v58  ;;  %1869 = vmatprep.subr.bf16.mxu0 %v2543_v58  ;;  %v2605_v59 = vsub.f32 %v230_v63, %v345_v34  ;;  %v2609_v27 = vsub.f32 %v232_v26, %v349_v37  ;;  %v357_v58 = vand.u32 4294901760, %v236_v43 }
  0x80   : > { %3426 = vst [vmem:[#allocation76_spill] sm:$0xff] %v2581_v23  ;;  %3427 = vst [vmem:[#allocation77_spill] sm:$0xff] %v2583_v20  ;;  %v235_v20 = vld [vmem:[#allocation5 + $0x1d0] sm:$0xff]  ;;  %v2601_v23 = vsub.f32 %v227_v22, %v343_v8  ;;  %v2615_v1 = vsub.f32 %v229_v61, %v347_v62  ;;  %v355_v8 = vand.u32 4294901760, %v233_v15  ;;  %v2618_v63 = vsub.f32 %v176_v33, %v2607_v55 }
  0x81   : > { %3428 = vst [vmem:[#allocation78_spill] sm:$0xff] %v2588_v28  ;;  %3429 = vst [vmem:[#allocation79_spill] sm:$0xff] %v2590_v30  ;;  %v2611_v30 = vand.u32 4294901760, %v175_v57  ;;  %v359_v22 = vand.u32 4294901760, %v235_v20  ;;  %v2622_v26 = vpack.c.bf16 %v351_v10, %v347_v62  ;;  %v2624_v34 = vsub.f32 %v231_v48, %v351_v10 }
  0x82   : > { %3430 = vst [vmem:[#allocation80_spill] sm:$0xff] %v2592_v36  ;;  %3431 = vst [vmem:[#allocation81_spill] sm:$0xff] %v2597_v13  ;;  %v353_v36 = vand.u32 4294901760, %v234_v9  ;;  %1679 = vmatpush1.bf16.msra.mxu1 %v2551_v16  ;;  %1871 = vmatpush1.bf16.msra.mxu0 %v2551_v16  ;;  %v388_v61 = vand.u32 4294901760, %v2428_v45  ;;  %v371_v16 = vand.u32 4294901760, %v2618_v63  ;;  %v394_v33 = vand.u32 4294901760, %v2432_v47 }
  0x83   : > { %3432 = vst [vmem:[#allocation82_spill] sm:$0xff] %v2599_v38  ;;  %3433 = vst [vmem:[#allocation83_spill] sm:$0xff] %v2601_v23  ;;  %1681 = vmatprep.subr.bf16.mxu1 %v2557_v40  ;;  %1873 = vmatprep.subr.bf16.mxu0 %v2557_v40  ;;  %v2635_v40 = vsub.f32 %v236_v43, %v357_v58  ;;  %v361_v62 = vand.u32 4294901760, %v238_v42  ;;  %v2638_v48 = vsub.f32 %v175_v57, %v2611_v30 }
  0x84   : > { %3434 = vst [vmem:[#allocation84_spill] sm:$0xff] %v2603_v19  ;;  %3435 = vst [vmem:[#allocation85_spill] sm:$0xff] %v2605_v59  ;;  %v2626_v37 = vsub.f32 %v234_v9, %v353_v36  ;;  %v406_v59 = vand.u32 4294901760, %v2434_v50  ;;  %v2633_v23 = vpack.c.bf16 %v357_v58, %v353_v36  ;;  %v2642_v9 = vpack.c.bf16 %v359_v22, %v355_v8 }
  0x85   : > { %3436 = vst [vmem:[#allocation86_spill] sm:$0xff] %v2607_v55  ;;  %3437 = vst [vmem:[#allocation87_spill] sm:$0xff] %v2609_v27  ;;  %v240_v27 = vld [vmem:[#allocation5 + $0x1f8] sm:$0xff]  ;;  %v372_v38 = vsub.f32 %v2618_v63, %v371_v16  ;;  %v412_v36 = vand.u32 4294901760, %v2436_v51  ;;  %v2648_v58 = vsub.f32 %v233_v15, %v355_v8  ;;  %v2650_v43 = vsub.f32 %v235_v20, %v359_v22 }
  0x86   : > { %3438 = vst [vmem:[#allocation88_spill] sm:$0xff] %v2611_v30  ;;  %3439 = vst [vmem:[#allocation89_spill] sm:$0xff] %v2615_v1  ;;  %v400_v1 = vand.u32 4294901760, %v2430_v46  ;;  %1683 = vmatpush1.bf16.msra.mxu1 %v2565_v29  ;;  %1875 = vmatpush1.bf16.msra.mxu0 %v2565_v29  ;;  %v365_v10 = vand.u32 4294901760, %v240_v27  ;;  %v389_v57 = vsub.f32 %v2428_v45, %v388_v61  ;;  %v424_v29 = vand.u32 4294901760, %v2438_v52 }
  0x87   : > { %3440 = vst [vmem:[#allocation90_spill] sm:$0xff] %v2618_v63  ;;  %3441 = vst [vmem:[#allocation91_spill] sm:$0xff] %v2622_v26  ;;  %1685 = vmatprep.subr.bf16.mxu1 %v2573_v14  ;;  %1877 = vmatprep.subr.bf16.mxu0 %v2573_v14  ;;  %v373_v30 = vand.u32 4294901760, %v372_v38  ;;  %v395_v63 = vsub.f32 %v2432_v47, %v394_v33  ;;  %v407_v0 = vsub.f32 %v2434_v50, %v406_v59 }
  0x88   : > { %3442 = vst [vmem:[#allocation92_spill] sm:$0xff] %v2624_v34  ;;  %3443 = vst [vmem:[#allocation93_spill] sm:$0xff] %v2626_v37  ;;  %v237_v37 = vld [vmem:[#allocation5 + $0x1e0] sm:$0xff]  ;;  %v239_v34 = vld [vmem:[#allocation5 + $0x1f0] sm:$0xff]  ;;  %1113 = vmatprep.mubr.f32.mxu0 %v371_v16  ;;  %v2657_v11 = vsub.f32 %v238_v42, %v361_v62  ;;  %v413_v20 = vsub.f32 %v2436_v51, %v412_v36  ;;  %v425_v38 = vsub.f32 %v2438_v52, %v424_v29 }
  0x89   : > { %3444 = vst [vmem:[#allocation94_spill] sm:$0xff] %v2633_v23  ;;  %3445 = vst [vmem:[#allocation95_spill] sm:$0xff] %v2635_v40  ;;  %v401_v40 = vsub.f32 %v2430_v46, %v400_v1  ;;  %v363_v41 = vand.u32 4294901760, %v237_v37  ;;  %v367_v14 = vand.u32 4294901760, %v239_v34  ;;  %v418_v16 = vand.u32 4294901760, %v2440_v53  ;;  %374 = vmatprep.mubr.f32.mxu1 %v373_v30 }
  0x8a   : > { %3446 = vst [vmem:[#allocation96_spill] sm:$0xff] %v2638_v48  ;;  %3447 = vst [vmem:[#allocation97_spill] sm:$0xff] %v2642_v9  ;;  %1687 = vmatpush1.bf16.msra.mxu1 %v2579_v44  ;;  %1879 = vmatpush1.bf16.msra.mxu0 %v2579_v44  ;;  %v430_v8 = vand.u32 4294901760, %v2442_v54  ;;  %v2668_v22 = vpack.c.bf16 %v365_v10, %v361_v62  ;;  %v2670_v42 = vsub.f32 %v240_v27, %v365_v10 }
  0x8b   : > { %1689 = vmatprep.subr.bf16.mxu1 %v2588_v28  ;;  %1881 = vmatprep.subr.bf16.mxu0 %v2588_v28  ;;  %v2672_v15 = vsub.f32 %v237_v37, %v363_v41  ;;  %v390_v44 = vand.u32 4294901760, %v389_v57  ;;  %v402_v50 = vand.u32 4294901760, %v401_v40  ;;  %v396_v51 = vand.u32 4294901760, %v395_v63 }
  0x8c   : > { %3448 = vst [vmem:[#allocation98_spill] sm:$0xff] %v2668_v22  ;;  %v408_v47 = vand.u32 4294901760, %v407_v0  ;;  %v2674_v52 = vpack.c.bf16 %v367_v14, %v363_v41  ;;  %v3451_v46 = vand.u32 4294901760, %v2638_v48  ;;  %v436_v28 = vand.u32 4294901760, %v2448_v60 }
  0x8d   : > { %3449 = vst [vmem:[#allocation99_spill] sm:$0xff] %v2672_v15  ;;  %v448_v62 = vand.u32 4294901760, %v2455_v2  ;;  %v414_v30 = vand.u32 4294901760, %v413_v20  ;;  %v426_v27 = vand.u32 4294901760, %v425_v38  ;;  %v419_v40 = vsub.f32 %v2440_v53, %v418_v16 }
  0x8e   : > { %3450 = vst [vmem:[#allocation100_spill] sm:$0xff] %v2674_v52  ;;  %v2679_v45 = vsub.f32 %v2638_v48, %v3451_v46  ;;  %1691 = vmatpush1.bf16.msra.mxu1 %v2597_v13  ;;  %1883 = vmatpush1.bf16.msra.mxu0 %v2597_v13  ;;  %v431_v0 = vsub.f32 %v2442_v54, %v430_v8  ;;  %v442_v37 = vand.u32 4294901760, %v2458_v3  ;;  %v454_v38 = vand.u32 4294901760, %v2461_v4 }
  0x8f   : > { %1693 = vmatprep.subr.bf16.mxu1 %v2603_v19  ;;  %1885 = vmatprep.subr.bf16.mxu0 %v2603_v19  ;;  %v2689_v46 = vsub.f32 %v239_v34, %v367_v14  ;;  %v1896_v41 = vpack.c.bf16 %v400_v1, %v388_v61  ;;  %v2691_v63 = vpack.c.bf16 %v406_v59, %v394_v33  ;;  %v478_v1 = vand.u32 4294901760, %v2470_v12 }
  0x90   : > { %v1704_v10 = vpack.c.bf16 %v402_v50, %v390_v44  ;;  %v2694_v57 = vpack.c.bf16 %v408_v47, %v396_v51  ;;  %v2696_v20 = vpack.c.bf16 %v424_v29, %v412_v36  ;;  %v379_v13 = vand.u32 4294901760, %v2679_v45 }
  0x91   : > { %3452 = vst [vmem:[#allocation101_spill] sm:$0xff] %v2689_v46  ;;  %v2700_v15 = vpack.c.bf16 %v430_v8, %v418_v16  ;;  %v437_v19 = vsub.f32 %v2448_v60, %v436_v28  ;;  %v449_v14 = vsub.f32 %v2455_v2, %v448_v62  ;;  %v2706_v59 = vpack.c.bf16 %v426_v27, %v414_v30 }
  0x92   : > { %1695 = vmatpush1.bf16.msra.mxu1 %v2622_v26  ;;  %1887 = vmatpush1.bf16.msra.mxu0 %v2622_v26  ;;  %v420_v47 = vand.u32 4294901760, %v419_v40  ;;  %v432_v50 = vand.u32 4294901760, %v431_v0  ;;  %v460_v51 = vand.u32 4294901760, %v2463_v5  ;;  %v443_v45 = vsub.f32 %v2458_v3, %v442_v37 }
  0x93   : > { %1697 = vmatprep.subr.bf16.mxu1 %v2633_v23  ;;  %1889 = vmatprep.subr.bf16.mxu0 %v2633_v23  ;;  %v472_v44 = vand.u32 4294901760, %v2465_v6  ;;  %v466_v29 = vand.u32 4294901760, %v2467_v7  ;;  %v455_v34 = vsub.f32 %v2461_v4, %v454_v38  ;;  %v484_v61 = vand.u32 4294901760, %v2476_v17 }
  0x94   : > { %v496_v33 = vand.u32 4294901760, %v2478_v18  ;;  %v490_v36 = vand.u32 4294901760, %v2483_v24  ;;  %v438_v16 = vand.u32 4294901760, %v437_v19  ;;  %v450_v8 = vand.u32 4294901760, %v449_v14 }
  0x95   : > { %v2719_v30 = vpack.c.bf16 %v448_v62, %v436_v28  ;;  %v502_v27 = vand.u32 4294901760, %v2485_v25  ;;  %v1710_v40 = vpack.c.bf16 %v432_v50, %v420_v47  ;;  %v461_v0 = vsub.f32 %v2463_v5, %v460_v51 }
  0x96   : > { %1699 = vmatpush1.bf16.msra.mxu1 %v2642_v9  ;;  %1891 = vmatpush1.bf16.msra.mxu0 %v2642_v9  ;;  %v508_v23 = vand.u32 4294901760, %v2487_v31  ;;  %v520_v26 = vand.u32 4294901760, %v2489_v32  ;;  %v444_v19 = vand.u32 4294901760, %v443_v45  ;;  %v473_v28 = vsub.f32 %v2465_v6, %v472_v44 }
  0x97   : > { %1701 = vmatprep.subr.bf16.mxu1 %v2668_v22  ;;  %1893 = vmatprep.subr.bf16.mxu0 %v2668_v22  ;;  %v467_v62 = vsub.f32 %v2467_v7, %v466_v29  ;;  %v479_v14 = vsub.f32 %v2470_v12, %v478_v1  ;;  %v456_v46 = vand.u32 4294901760, %v455_v34  ;;  %v485_v47 = vsub.f32 %v2476_v17, %v484_v61 }
  0x98   : > { %v497_v50 = vsub.f32 %v2478_v18, %v496_v33  ;;  %v491_v9 = vsub.f32 %v2483_v24, %v490_v36  ;;  %v1712_v5 = vpack.c.bf16 %v450_v8, %v438_v16  ;;  %v2735_v4 = vpack.c.bf16 %v454_v38, %v442_v37 }
  0x99   : > { %v503_v3 = vsub.f32 %v2485_v25, %v502_v27  ;;  %v514_v45 = vand.u32 4294901760, %v2493_v35  ;;  %v462_v22 = vand.u32 4294901760, %v461_v0  ;;  %v2741_v12 = vpack.c.bf16 %v472_v44, %v460_v51 }
  0x9a   : > { %1703 = vmatpush1.bf16.msra.mxu1 %v2674_v52  ;;  %1895 = vmatpush1.bf16.msra.mxu0 %v2674_v52  ;;  %v509_v34 = vsub.f32 %v2487_v31, %v508_v23  ;;  %v521_v18 = vsub.f32 %v2489_v32, %v520_v26  ;;  %v474_v16 = vand.u32 4294901760, %v473_v28  ;;  %v468_v37 = vand.u32 4294901760, %v467_v62  ;;  %v3454_v62 = vld [vmem:[#allocation46_spill] sm:$0xff]  ;;  %v3508_v31 = vld [vmem:[#allocation53_spill] sm:$0xff] }
  0x9b   : > { %1705 = vmatprep.subr.bf16.mxu1 %v1704_v10  ;;  %1897 = vmatprep.subr.bf16.mxu0 %v1896_v41  ;;  %v480_v38 = vand.u32 4294901760, %v479_v14  ;;  %v526_v8 = vand.u32 4294901760, %v2497_v39  ;;  %v1714_v25 = vpack.c.bf16 %v456_v46, %v444_v19  ;;  %v486_v24 = vand.u32 4294901760, %v485_v47  ;;  %v3525_v32 = vld [vmem:[#allocation77_spill] sm:$0xff] }
  0x9c   : > { %v498_v17 = vand.u32 4294901760, %v497_v50  ;;  %v492_v7 = vand.u32 4294901760, %v491_v9  ;;  %v3453_v0 = vand.u32 4294901760, %v2638_v48  ;;  %v504_v51 = vand.u32 4294901760, %v503_v3  ;;  %v3465_v48 = vld [vmem:[#allocation62_spill] sm:$0xff] }
  0x9d   : > { %380 = vmatmul.mubr.f32.vlgmr.msra.gmra.mrb[0].mxu1 %v379_v13  ;;  %v515_v44 = vsub.f32 %v2493_v35, %v514_v45  ;;  %v532_v52 = vand.u32 4294901760, %v2503_v49  ;;  %v544_v41 = vand.u32 4294901760, %v2505_v56  ;;  %v1910_v10 = vpack.c.bf16 %v478_v1, %v466_v29  ;;  %v3457_v1 = vld [vmem:[#allocation50_spill] sm:$0xff] }
  0x9e   : > { %1117 = vmatmul.mubr.f32.vlgmr.msra.gmra.mrb[0].mxu0 %v3453_v0  ;;  %1707 = vmatpush1.bf16.msra.mxu1 %v2694_v57  ;;  %v2753_v46 = vpack.c.bf16 %v496_v33, %v484_v61  ;;  %v510_v19 = vand.u32 4294901760, %v509_v34  ;;  %v522_v9 = vand.u32 4294901760, %v521_v18  ;;  %v1716_v3 = vpack.c.bf16 %v474_v16, %v462_v22  ;;  %v3459_v34 = vld [vmem:[#allocation53_spill] sm:$0xff] }
  0x9f   : > { %1899 = vmatpush1.bf16.msra.mxu0 %v2691_v63  ;;  %1709 = vmatprep.subr.bf16.mxu1 %v2706_v59  ;;  %v1718_v13 = vpack.c.bf16 %v480_v38, %v468_v37  ;;  %v527_v28 = vsub.f32 %v2497_v39, %v526_v8  ;;  %v538_v14 = vand.u32 4294901760, %v3454_v62  ;;  %v1720_v47 = vpack.c.bf16 %v498_v17, %v486_v24  ;;  %v3455_v63 = vld [vmem:[#allocation47_spill] sm:$0xff]  ;;  %v3461_v38 = vld [vmem:[#allocation56_spill] sm:$0xff] }
  0xa0   : > { %1901 = vmatprep.subr.bf16.mxu0 %v2696_v20  ;;  %v2759_v50 = vpack.c.bf16 %v502_v27, %v490_v36  ;;  %v2761_v57 = vpack.c.bf16 %v520_v26, %v508_v23  ;;  %v550_v29 = vand.u32 4294901760, %v3455_v63  ;;  %771 = vmatprep.mubr.f32.mxu1 %v2607_v55  ;;  %v2765_v18 = vpack.c.bf16 %v504_v51, %v492_v7  ;;  %v3456_v23 = vld [vmem:[#allocation48_spill] sm:$0xff] }
  0xa1   : > { %v516_v59 = vand.u32 4294901760, %v515_v44  ;;  %v533_v20 = vsub.f32 %v2503_v49, %v532_v52  ;;  %v545_v22 = vsub.f32 %v2505_v56, %v544_v41  ;;  %1380 = vmatprep.mubr.f32.mxu0 %v2607_v55  ;;  %v2771_v17 = vpack.c.bf16 %v522_v9, %v510_v19  ;;  %v3458_v36 = vld [vmem:[#allocation52_spill] sm:$0xff] }
  0xa2   : > { %1711 = vmatpush1.bf16.msra.mxu1 %v1710_v40  ;;  %v2773_v24 = vpack.c.bf16 %v526_v8, %v514_v45  ;;  %v556_v26 = vand.u32 4294901760, %v3456_v23  ;;  %v568_v61 = vand.u32 4294901760, %v3457_v1  ;;  %v528_v7 = vand.u32 4294901760, %v527_v28  ;;  %v3460_v45 = vld [vmem:[#allocation55_spill] sm:$0xff]  ;;  %v3466_v39 = vld [vmem:[#allocation64_spill] sm:$0xff] }
  0xa3   : > { %1903 = vmatpush1.bf16.msra.mxu0 %v2700_v15  ;;  %1713 = vmatprep.subr.bf16.mxu1 %v1712_v5  ;;  %v539_v33 = vsub.f32 %v3454_v62, %v538_v14  ;;  %v562_v27 = vand.u32 4294901760, %v3458_v36  ;;  %v574_v40 = vand.u32 4294901760, %v3459_v34  ;;  %v2781_v16 = vpack.c.bf16 %v544_v41, %v532_v52  ;;  %v3462_v5 = vld [vmem:[#allocation58_spill] sm:$0xff]  ;;  %v3464_v41 = vld [vmem:[#allocation61_spill] sm:$0xff] }
  0xa4   : > { %1905 = vmatprep.subr.bf16.mxu0 %v2719_v30  ;;  %v551_v15 = vsub.f32 %v3455_v63, %v550_v29  ;;  %v580_v37 = vand.u32 4294901760, %v3460_v45  ;;  %v592_v8 = vand.u32 4294901760, %v3461_v38  ;;  %v534_v0 = vand.u32 4294901760, %v533_v20  ;;  %v3463_v30 = vld [vmem:[#allocation59_spill] sm:$0xff] }
  0xa5   : > { %v546_v51 = vand.u32 4294901760, %v545_v22  ;;  %v586_v44 = vand.u32 4294901760, %v3462_v5  ;;  %v598_v19 = vand.u32 4294901760, %v3463_v30  ;;  %v557_v9 = vsub.f32 %v3456_v23, %v556_v26 }
  0xa6   : > { %1715 = vmatpush1.bf16.msra.mxu1 %v1714_v25  ;;  %v569_v52 = vsub.f32 %v3457_v1, %v568_v61  ;;  %v604_v28 = vand.u32 4294901760, %v3464_v41  ;;  %v616_v55 = vand.u32 4294901760, %v3465_v48  ;;  %v1726_v20 = vpack.c.bf16 %v528_v7, %v516_v59 }
  0xa7   : > { %1907 = vmatpush1.bf16.msra.mxu0 %v2735_v4  ;;  %1717 = vmatprep.subr.bf16.mxu1 %v1716_v3  ;;  %v540_v22 = vand.u32 4294901760, %v539_v33  ;;  %v563_v63 = vsub.f32 %v3458_v36, %v562_v27  ;;  %v575_v62 = vsub.f32 %v3459_v34, %v574_v40  ;;  %v552_v25 = vand.u32 4294901760, %v551_v15 }
  0xa8   : > { %1909 = vmatprep.subr.bf16.mxu0 %v2741_v12  ;;  %v2796_v56 = vpack.c.bf16 %v550_v29, %v538_v14  ;;  %v581_v4 = vsub.f32 %v3460_v45, %v580_v37  ;;  %v593_v1 = vsub.f32 %v3461_v38, %v592_v8  ;;  %v1728_v23 = vpack.c.bf16 %v546_v51, %v534_v0  ;;  %v3467_v51 = vld [vmem:[#allocation65_spill] sm:$0xff] }
  0xa9   : > { %v587_v49 = vsub.f32 %v3462_v5, %v586_v44  ;;  %v599_v3 = vsub.f32 %v3463_v30, %v598_v19  ;;  %v610_v12 = vand.u32 4294901760, %v3466_v39  ;;  %v558_v59 = vand.u32 4294901760, %v557_v9 }
  0xaa   : > { %1719 = vmatpush1.bf16.msra.mxu1 %v1718_v13  ;;  %v570_v7 = vand.u32 4294901760, %v569_v52  ;;  %v605_v33 = vsub.f32 %v3464_v41, %v604_v28  ;;  %v617_v14 = vsub.f32 %v3465_v48, %v616_v55  ;;  %v1924_v29 = vpack.c.bf16 %v568_v61, %v556_v26  ;;  %v3468_v41 = vld [vmem:[#allocation67_spill] sm:$0xff] }
  0xab   : > { %1911 = vmatpush1.bf16.msra.mxu0 %v1910_v10  ;;  %1721 = vmatprep.subr.bf16.mxu1 %v1720_v47  ;;  %v564_v15 = vand.u32 4294901760, %v563_v63  ;;  %v576_v0 = vand.u32 4294901760, %v575_v62  ;;  %v622_v5 = vand.u32 4294901760, %v3467_v51  ;;  %v1730_v38 = vpack.c.bf16 %v552_v25, %v540_v22  ;;  %v3469_v63 = vld [vmem:[#allocation68_spill] sm:$0xff] }
  0xac   : > { %1913 = vmatprep.subr.bf16.mxu0 %v2753_v46  ;;  %v2807_v30 = vpack.c.bf16 %v574_v40, %v562_v27  ;;  %v582_v45 = vand.u32 4294901760, %v581_v4  ;;  %v594_v13 = vand.u32 4294901760, %v593_v1  ;;  %v588_v10 = vand.u32 4294901760, %v587_v49 }
  0xad   : > { %v600_v9 = vand.u32 4294901760, %v599_v3  ;;  %v611_v52 = vsub.f32 %v3466_v39, %v610_v12  ;;  %v628_v34 = vand.u32 4294901760, %v3468_v41  ;;  %v1732_v46 = vpack.c.bf16 %v570_v7, %v558_v59  ;;  %v3474_v7 = vld [vmem:[#allocation77_spill] sm:$0xff] }
  0xae   : > { %1723 = vmatpush1.bf16.msra.mxu1 %v2765_v18  ;;  %v606_v47 = vand.u32 4294901760, %v605_v33  ;;  %v618_v62 = vand.u32 4294901760, %v617_v14  ;;  %v640_v26 = vand.u32 4294901760, %v3469_v63  ;;  %v1734_v1 = vpack.c.bf16 %v576_v0, %v564_v15  ;;  %v3475_v14 = vld [vmem:[#allocation79_spill] sm:$0xff]  ;;  %v3476_v0 = vld [vmem:[#allocation80_spill] sm:$0xff] }
  0xaf   : > { %1915 = vmatpush1.bf16.msra.mxu0 %v2759_v50  ;;  %1725 = vmatprep.subr.bf16.mxu1 %v2771_v17  ;;  %v1928_v49 = vpack.c.bf16 %v592_v8, %v580_v37  ;;  %v623_v61 = vsub.f32 %v3467_v51, %v622_v5  ;;  %v634_v27 = vand.u32 4294901760, %v2569_v21  ;;  %v1736_v40 = vpack.c.bf16 %v594_v13, %v582_v45  ;;  %v3470_v50 = vld [vmem:[#allocation71_spill] sm:$0xff]  ;;  %v3471_v37 = vld [vmem:[#allocation73_spill] sm:$0xff] }
  0xb0   : > { %1917 = vmatprep.subr.bf16.mxu0 %v2761_v57  ;;  %v2818_v22 = vpack.c.bf16 %v598_v19, %v586_v44  ;;  %v2820_v18 = vpack.c.bf16 %v616_v55, %v604_v28  ;;  %v646_v25 = vand.u32 4294901760, %v3470_v50  ;;  %v2823_v4 = vpack.c.bf16 %v600_v9, %v588_v10  ;;  %v3472_v55 = vld [vmem:[#allocation74_spill] sm:$0xff]  ;;  %v3473_v28 = vld [vmem:[#allocation76_spill] sm:$0xff] }
  0xb1   : > { %v612_v3 = vand.u32 4294901760, %v611_v52  ;;  %v2825_v59 = vpack.c.bf16 %v622_v5, %v610_v12  ;;  %v629_v57 = vsub.f32 %v3468_v41, %v628_v34  ;;  %v2829_v17 = vpack.c.bf16 %v618_v62, %v606_v47  ;;  %v3477_v9 = vld [vmem:[#allocation82_spill] sm:$0xff]  ;;  %v3478_v52 = vld [vmem:[#allocation83_spill] sm:$0xff]  ;;  %v3479_v47 = vld [vmem:[#allocation85_spill] sm:$0xff] }
  0xb2   : > { %1727 = vmatpush1.bf16.msra.mxu1 %v1726_v20  ;;  %v641_v45 = vsub.f32 %v3469_v63, %v640_v26  ;;  %v652_v8 = vand.u32 4294901760, %v3471_v37  ;;  %v664_v44 = vand.u32 4294901760, %v3472_v55  ;;  %v624_v19 = vand.u32 4294901760, %v623_v61 }
  0xb3   : > { %1919 = vmatpush1.bf16.msra.mxu0 %v2773_v24  ;;  %1729 = vmatprep.subr.bf16.mxu1 %v1728_v23  ;;  %v635_v5 = vsub.f32 %v2569_v21, %v634_v27  ;;  %v658_v12 = vand.u32 4294901760, %v3473_v28  ;;  %v670_v20 = vand.u32 4294901760, %v3474_v7  ;;  %v2838_v33 = vpack.c.bf16 %v640_v26, %v628_v34 }
  0xb4   : > { %1921 = vmatprep.subr.bf16.mxu0 %v2781_v16  ;;  %v647_v24 = vsub.f32 %v3470_v50, %v646_v25  ;;  %v676_v15 = vand.u32 4294901760, %v3475_v14  ;;  %v688_v13 = vand.u32 4294901760, %v3476_v0  ;;  %v630_v10 = vand.u32 4294901760, %v629_v57  ;;  %v3480_v50 = vld [vmem:[#allocation87_spill] sm:$0xff] }
  0xb5   : > { %v682_v23 = vand.u32 4294901760, %v3477_v9  ;;  %v694_v16 = vand.u32 4294901760, %v3478_v52  ;;  %v700_v62 = vand.u32 4294901760, %v3479_v47  ;;  %v642_v61 = vand.u32 4294901760, %v641_v45 }
  0xb6   : > { %1731 = vmatpush1.bf16.msra.mxu1 %v1730_v38  ;;  %v653_v34 = vsub.f32 %v3471_v37, %v652_v8  ;;  %v665_v26 = vsub.f32 %v3472_v55, %v664_v44  ;;  %v712_v21 = vand.u32 4294901760, %v3480_v50  ;;  %v1742_v63 = vpack.c.bf16 %v624_v19, %v612_v3 }
  0xb7   : > { %1923 = vmatpush1.bf16.msra.mxu0 %v2796_v56  ;;  %1733 = vmatprep.subr.bf16.mxu1 %v1732_v46  ;;  %v636_v57 = vand.u32 4294901760, %v635_v5  ;;  %v659_v41 = vsub.f32 %v3473_v28, %v658_v12  ;;  %v671_v51 = vsub.f32 %v3474_v7, %v670_v20  ;;  %v648_v39 = vand.u32 4294901760, %v647_v24 }
  0xb8   : > { %1925 = vmatprep.subr.bf16.mxu0 %v1924_v29  ;;  %v2852_v48 = vpack.c.bf16 %v646_v25, %v634_v27  ;;  %v677_v56 = vsub.f32 %v3475_v14, %v676_v15  ;;  %v689_v38 = vsub.f32 %v3476_v0, %v688_v13  ;;  %v683_v45 = vsub.f32 %v3477_v9, %v682_v23  ;;  %v3481_v27 = vld [vmem:[#allocation89_spill] sm:$0xff]  ;;  %v3482_v9 = vld [vmem:[#allocation92_spill] sm:$0xff] }
  0xb9   : > { %v695_v55 = vsub.f32 %v3478_v52, %v694_v16  ;;  %v701_v46 = vsub.f32 %v3479_v47, %v700_v62  ;;  %v713_v29 = vsub.f32 %v3480_v50, %v712_v21  ;;  %v1744_v3 = vpack.c.bf16 %v642_v61, %v630_v10 }
  0xba   : > { %1735 = vmatpush1.bf16.msra.mxu1 %v1734_v1  ;;  %v654_v19 = vand.u32 4294901760, %v653_v34  ;;  %v666_v5 = vand.u32 4294901760, %v665_v26  ;;  %v3344_v25 = vand.u32 4294901760, %v3481_v27  ;;  %v1940_v24 = vpack.c.bf16 %v664_v44, %v652_v8 }
  0xbb   : > { %1927 = vmatpush1.bf16.msra.mxu0 %v2807_v30  ;;  %1737 = vmatprep.subr.bf16.mxu1 %v1736_v40  ;;  %v660_v0 = vand.u32 4294901760, %v659_v41  ;;  %v672_v14 = vand.u32 4294901760, %v671_v51  ;;  %v3343_v7 = vand.u32 4294901760, %v3482_v9  ;;  %v1746_v52 = vpack.c.bf16 %v648_v39, %v636_v57  ;;  %v3483_v39 = vld [vmem:[#allocation93_spill] sm:$0xff] }
  0xbc   : > { %1929 = vmatprep.subr.bf16.mxu0 %v1928_v49  ;;  %v2863_v28 = vpack.c.bf16 %v670_v20, %v658_v12  ;;  %v678_v47 = vand.u32 4294901760, %v677_v56  ;;  %v690_v50 = vand.u32 4294901760, %v689_v38  ;;  %v684_v1 = vand.u32 4294901760, %v683_v45 }
  0xbd   : > { %v696_v37 = vand.u32 4294901760, %v695_v55  ;;  %v702_v30 = vand.u32 4294901760, %v701_v46  ;;  %v714_v10 = vand.u32 4294901760, %v713_v29  ;;  %v1748_v40 = vpack.c.bf16 %v666_v5, %v654_v19  ;;  %v3491_v46 = vld [vmem:[#allocation26_spill] sm:$0xff]  ;;  %v3492_v29 = vld [vmem:[#allocation27_spill] sm:$0xff]  ;;  %v3493_v5 = vld [vmem:[#allocation28_spill] sm:$0xff] }
  0xbe   : > { %1739 = vmatpush1.bf16.msra.mxu1 %v2823_v4  ;;  %v2867_v49 = vpack.c.bf16 %v688_v13, %v676_v15  ;;  %v2872_v41 = vsub.f32 %v3481_v27, %v3344_v25  ;;  %v3342_v51 = vand.u32 4294901760, %v3483_v39  ;;  %v1750_v8 = vpack.c.bf16 %v672_v14, %v660_v0  ;;  %v3485_v14 = vld [vmem:[#allocation18_spill] sm:$0xff]  ;;  %v3486_v0 = vld [vmem:[#allocation19_spill] sm:$0xff] }
  0xbf   : > { %1931 = vmatpush1.bf16.msra.mxu0 %v2818_v22  ;;  %1741 = vmatprep.subr.bf16.mxu1 %v2829_v17  ;;  %v2880_v4 = vsub.f32 %v3482_v9, %v3343_v7  ;;  %v3484_v22 = vld [vmem:[#allocation95_spill] sm:$0xff]  ;;  %v3340_v44 = vand.u32 4294901760, %v2648_v58  ;;  %v1752_v12 = vpack.c.bf16 %v690_v50, %v678_v47  ;;  %v2884_v20 = vpack.c.bf16 %v694_v16, %v682_v23  ;;  %v3487_v50 = vld [vmem:[#allocation20_spill] sm:$0xff]  ;;  %v3488_v23 = vld [vmem:[#allocation21_spill] sm:$0xff] }
  0xc0   : > { %1933 = vmatprep.subr.bf16.mxu0 %v2820_v18  ;;  %v3341_v55 = vand.u32 4294901760, %v3484_v22  ;;  %v2886_v15 = vpack.c.bf16 %v712_v21, %v700_v62  ;;  %v3339_v13 = vand.u32 4294901760, %v2650_v43  ;;  %v1754_v17 = vpack.c.bf16 %v696_v37, %v684_v1  ;;  %v3489_v16 = vld [vmem:[#allocation22_spill] sm:$0xff]  ;;  %v3490_v47 = vld [vmem:[#allocation23_spill] sm:$0xff]  ;;  %v3515_v62 = vld [vmem:[#allocation64_spill] sm:$0xff] }
  0xc1   : > { %v2889_v61 = vpack.c.bf16 %v714_v10, %v702_v30  ;;  %v3338_v18 = vand.u32 4294901760, %v2657_v11  ;;  %v708_v26 = vand.u32 4294901760, %v2872_v41  ;;  %v2899_v21 = vsub.f32 %v3483_v39, %v3342_v51  ;;  %v3494_v30 = vld [vmem:[#allocation29_spill] sm:$0xff]  ;;  %v3495_v10 = vld [vmem:[#allocation30_spill] sm:$0xff]  ;;  %v3527_v37 = vld [vmem:[#allocation80_spill] sm:$0xff] }
  0xc2   : > { %1743 = vmatpush1.bf16.msra.mxu1 %v1742_v63  ;;  %v720_v63 = vand.u32 4294901760, %v2880_v4  ;;  %v2913_v57 = vsub.f32 %v2648_v58, %v3340_v44  ;;  %v3348_v56 = vand.u32 4294901760, %v2670_v42  ;;  %v743_v38 = vsub.f32 %v2650_v43, %v3339_v13  ;;  %v3507_v25 = vld [vmem:[#allocation50_spill] sm:$0xff]  ;;  %v3521_v1 = vld [vmem:[#allocation101_spill] sm:$0xff]  ;;  %v3524_v13 = vld [vmem:[#allocation76_spill] sm:$0xff] }
  0xc3   : > { %1935 = vmatpush1.bf16.msra.mxu0 %v2825_v59  ;;  %1745 = vmatprep.subr.bf16.mxu1 %v1744_v3  ;;  %v737_v59 = vsub.f32 %v3484_v22, %v3341_v55  ;;  %v2928_v19 = vsub.f32 %v2657_v11, %v3338_v18  ;;  %v726_v45 = vand.u32 4294901760, %v2899_v21  ;;  %v3516_v21 = vld [vmem:[#allocation65_spill] sm:$0xff]  ;;  %v766_v35 = vand.u32 4294901760, %v3521_v1  ;;  %v3526_v3 = vld [vmem:[#allocation79_spill] sm:$0xff]  ;;  %v3528_v44 = vld [vmem:[#allocation82_spill] sm:$0xff] }
  0xc4   : > { %1937 = vmatprep.subr.bf16.mxu0 %v2838_v33  ;;  %v761_v33 = vsub.f32 %v2670_v42, %v3348_v56  ;;  %v3529_v7 = vld [vmem:[#allocation83_spill] sm:$0xff]  ;;  %v3533_v18 = vand.u32 4294901760, %v3482_v9  ;;  %v732_v56 = vand.u32 4294901760, %v2913_v57  ;;  %v744_v34 = vand.u32 4294901760, %v743_v38 }
  0xc5   : > { %v738_v55 = vand.u32 4294901760, %v737_v59  ;;  %v1758_v59 = vpack.c.bf16 %v720_v63, %v708_v26  ;;  %v767_v51 = vsub.f32 %v3521_v1, %v766_v35  ;;  %v3534_v63 = vand.u32 4294901760, %v3483_v39 }
  0xc6   : > { %1747 = vmatpush1.bf16.msra.mxu1 %v1746_v52  ;;  %v3501_v52 = vld [vmem:[#allocation99_spill] sm:$0xff]  ;;  %v1762_v57 = vpack.c.bf16 %v744_v34, %v732_v56  ;;  %v3536_v38 = vand.u32 4294901760, %v2648_v58  ;;  %v3540_v34 = vpack.c.bf16 %v3486_v0, %v3485_v14  ;;  %v3542_v56 = vld [vmem:[#allocation88_spill] sm:$0xff]  ;;  %v3547_v14 = vld [vmem:[#allocation90_spill] sm:$0xff] }
  0xc7   : > { %1939 = vmatpush1.bf16.msra.mxu0 %v2852_v48  ;;  %1749 = vmatprep.subr.bf16.mxu1 %v1748_v40  ;;  %v754_v41 = vand.u32 4294901760, %v3501_v52  ;;  %v3522_v40 = vld [vmem:[#allocation73_spill] sm:$0xff]  ;;  %v1760_v26 = vpack.c.bf16 %v738_v55, %v726_v45  ;;  %v3539_v45 = vand.u32 4294901760, %v2670_v42  ;;  %v3548_v0 = vld [vmem:[#allocation86_spill] sm:$0xff] }
  0xc8   : > { %1941 = vmatprep.subr.bf16.mxu0 %v1940_v24  ;;  %v3523_v24 = vld [vmem:[#allocation74_spill] sm:$0xff] }
  0xc9   : > { %v755_v4 = vsub.f32 %v3501_v52, %v754_v41  ;;  %v768_v52 = vand.u32 4294901760, %v767_v51  ;;  %v3541_v51 = vld [vmem:[#allocation11_spill] sm:$0xff] }
  0xca   : > { %1751 = vmatpush1.bf16.msra.mxu1 %v1750_v8  ;;  %v3532_v8 = vand.u32 4294901760, %v3481_v27 }
  0xcb   : > { %1943 = vmatpush1.bf16.msra.mxu0 %v2863_v28  ;;  %1753 = vmatprep.subr.bf16.mxu1 %v1752_v12  ;;  %v3531_v28 = vld [vmem:[#allocation87_spill] sm:$0xff] }
  0xcc   : > { %1945 = vmatprep.subr.bf16.mxu0 %v2867_v49  ;;  %v1950_v48 = vpack.c.bf16 %v3533_v18, %v3532_v8  ;;  %v3535_v49 = vand.u32 4294901760, %v3484_v22  ;;  %v3537_v8 = vand.u32 4294901760, %v2650_v43 }
  0xce   : > { %1755 = vmatpush1.bf16.msra.mxu1 %v1754_v17  ;;  %v1952_v18 = vpack.c.bf16 %v3535_v49, %v3534_v63  ;;  %v750_v17 = vand.u32 4294901760, %v2928_v19  ;;  %v1954_v12 = vpack.c.bf16 %v3537_v8, %v3536_v38  ;;  %v1958_v19 = vpack.c.bf16 %v766_v35, %v754_v41  ;;  %v3546_v41 = vld [vmem:[#allocation13_spill] sm:$0xff]  ;;  %v3572_v38 = vld [vmem:[#allocation40_spill] sm:$0xff] }
  0xcf   : > { %1947 = vmatpush1.bf16.msra.mxu0 %v2884_v20  ;;  %1757 = vmatprep.subr.bf16.mxu1 %v2889_v61  ;;  %v762_v20 = vand.u32 4294901760, %v761_v33  ;;  %v756_v61 = vand.u32 4294901760, %v755_v4  ;;  %v3543_v4 = vpack.c.bf16 %v3488_v23, %v3487_v50  ;;  %v3545_v35 = vpack.c.bf16 %v3490_v47, %v3489_v16  ;;  %v3552_v23 = vld [vmem:[#allocation15_spill] sm:$0xff]  ;;  %v3554_v47 = vld [vmem:[#allocation16_spill] sm:$0xff] }
  0xd0   : > { %1949 = vmatprep.subr.bf16.mxu0 %v2886_v15  ;;  %v3538_v15 = vand.u32 4294901760, %v2657_v11  ;;  %v3551_v50 = vpack.c.bf16 %v2455_v2, %v2448_v60  ;;  %v3553_v16 = vpack.c.bf16 %v3492_v29, %v3491_v46  ;;  %v3558_v60 = vld [vmem:[#allocation24_spill] sm:$0xff]  ;;  %v3559_v2 = vld [vmem:[#allocation33_spill] sm:$0xff] }
  0xd1   : > { %v1764_v55 = vpack.c.bf16 %v762_v20, %v750_v17  ;;  %v1766_v33 = vpack.c.bf16 %v768_v52, %v756_v61  ;;  %v3544_v52 = vld [vmem:[#allocation12_spill] sm:$0xff]  ;;  %v3562_v46 = vld [vmem:[#allocation25_spill] sm:$0xff]  ;;  %v3574_v61 = vld [vmem:[#allocation39_spill] sm:$0xff] }
  0xd2   : > { %1759 = vmatpush1.bf16.msra.mxu1 %v1758_v59  ;;  %v1956_v49 = vpack.c.bf16 %v3539_v45, %v3538_v15  ;;  %v3555_v59 = vpack.c.bf16 %v2465_v6, %v3493_v5  ;;  %v3563_v29 = vld [vmem:[#allocation36_spill] sm:$0xff]  ;;  %v3566_v6 = vld [vmem:[#allocation31_spill] sm:$0xff]  ;;  %v3567_v5 = vld [vmem:[#allocation38_spill] sm:$0xff] }
  0xd3   : > { %1951 = vmatpush1.bf16.msra.mxu0 %v1950_v48  ;;  %1761 = vmatprep.subr.bf16.mxu1 %v1760_v26  ;;  %v3549_v48 = vpack.c.bf16 %v2442_v54, %v2440_v53  ;;  %v3556_v53 = vld [vmem:[#allocation17_spill] sm:$0xff]  ;;  %v3557_v54 = vpack.c.bf16 %v3495_v10, %v3494_v30  ;;  %v3560_v26 = vld [vmem:[#allocation32_spill] sm:$0xff]  ;;  %v3570_v30 = vld [vmem:[#allocation34_spill] sm:$0xff] }
  0xd4   : > { %1953 = vmatprep.subr.bf16.mxu0 %v1952_v18  ;;  %v3561_v63 = vpack.c.bf16 %v3559_v2, %v3560_v26  ;;  %v3564_v18 = vld [vmem:[#allocation35_spill] sm:$0xff]  ;;  %v3568_v20 = vld [vmem:[#allocation37_spill] sm:$0xff]  ;;  %v3602_v2 = vld [vmem:[#allocation68_spill] sm:$0xff] }
  0xd5   : > { %v3565_v17 = vpack.c.bf16 %v3563_v29, %v3564_v18  ;;  %v3571_v10 = vld [vmem:[#allocation41_spill] sm:$0xff]  ;;  %v3576_v15 = vld [vmem:[#allocation43_spill] sm:$0xff]  ;;  %v3607_v18 = vld [vmem:[#allocation70_spill] sm:$0xff] }
  0xd6   : > { %1763 = vmatpush1.bf16.msra.mxu1 %v1762_v57  ;;  %v3569_v57 = vpack.c.bf16 %v3567_v5, %v3568_v20  ;;  %v3573_v8 = vpack.c.bf16 %v3571_v10, %v3572_v38  ;;  %v3603_v26 = vld [vmem:[#allocation67_spill] sm:$0xff]  ;;  %v3610_v5 = vpack.c.bf16 %v3523_v24, %v3522_v40  ;;  %v3616_v10 = vpack.c.bf16 %v3529_v7, %v3528_v44  ;;  %v3617_v40 = vld [vmem:[#allocation81_spill] sm:$0xff]  ;;  %v3624_v44 = vld [vmem:[#allocation94_spill] sm:$0xff] }
  0xd7   : > { %1955 = vmatpush1.bf16.msra.mxu0 %v1954_v12  ;;  %1765 = vmatprep.subr.bf16.mxu1 %v1764_v55  ;;  %v3550_v12 = vld [vmem:[#allocation14_spill] sm:$0xff]  ;;  %v3575_v55 = vld [vmem:[#allocation44_spill] sm:$0xff]  ;;  %v3606_v29 = vld [vmem:[#allocation71_spill] sm:$0xff]  ;;  %v3623_v7 = vpack.c.bf16 %v3484_v22, %v3483_v39 }
  0xd8   : > { %1957 = vmatprep.subr.bf16.mxu0 %v1956_v49  ;;  %v3577_v45 = vpack.c.bf16 %v3575_v55, %v3576_v15  ;;  %v3578_v49 = vld [vmem:[#allocation42_spill] sm:$0xff]  ;;  %v3613_v20 = vld [vmem:[#allocation75_spill] sm:$0xff]  ;;  %v3618_v24 = vld [vmem:[#allocation85_spill] sm:$0xff] }
  0xd9   : > { %v3619_v38 = vpack.c.bf16 %v3531_v28, %v3618_v24  ;;  %v3626_v28 = vld [vmem:[#allocation97_spill] sm:$0xff]  ;;  %v3631_v39 = vld [vmem:[#allocation100_spill] sm:$0xff] }
  0xda   : > { %1767 = vmatpush1.bf16.msra.mxu1 %v1766_v33  ;;  %v3579_v33 = vld [vmem:[#allocation47_spill] sm:$0xff]  ;;  %v3632_v22 = vld [vmem:[#allocation96_spill] sm:$0xff] }
  0xdb   : > { %1959 = vmatpush1.bf16.msra.mxu0 %v1958_v19  ;;  %1769 = vmatprep.subr.bf16.mxu1 %v3540_v34  ;;  %v3580_v19 = vld [vmem:[#allocation46_spill] sm:$0xff] }
  0xdc   : > { %1961 = vmatprep.subr.bf16.mxu0 %v3541_v51  ;;  %v3581_v34 = vpack.c.bf16 %v3579_v33, %v3580_v19  ;;  %v3582_v51 = vld [vmem:[#allocation45_spill] sm:$0xff] }
  0xdd   : > { %773 = vmatmul.mubr.f32.vlgmr.msra.gmra.mrb[0].mxu1 %v3542_v56 }
  0xde   : > { %1382 = vmatmul.mubr.f32.vlgmr.msra.gmra.mrb[0].mxu0 %v3542_v56  ;;  %1771 = vmatpush1.bf16.msra.mxu1 %v3543_v4  ;;  %v3583_v4 = vld [vmem:[#allocation48_spill] sm:$0xff] }
  0xdf   : > { %1963 = vmatpush1.bf16.msra.mxu0 %v3544_v52  ;;  %1773 = vmatprep.subr.bf16.mxu1 %v3545_v35  ;;  %v3584_v52 = vpack.c.bf16 %v3507_v25, %v3583_v4  ;;  %v3585_v35 = vld [vmem:[#allocation49_spill] sm:$0xff] }
  0xe0   : > { %1965 = vmatprep.subr.bf16.mxu0 %v3546_v41  ;;  %973 = vmatprep.mubr.f32.mxu1 %v3547_v14  ;;  %v3586_v41 = vpack.c.bf16 %v3508_v31, %v3458_v36  ;;  %v3587_v14 = vld [vmem:[#allocation51_spill] sm:$0xff]  ;;  %v3595_v25 = vld [vmem:[#allocation57_spill] sm:$0xff]  ;;  %v3599_v31 = vld [vmem:[#allocation60_spill] sm:$0xff]  ;;  %v3600_v36 = vpack.c.bf16 %v3516_v21, %v3515_v62  ;;  %v3612_v21 = vpack.c.bf16 %v3525_v32, %v3524_v13 }
  0xe1   : > { %1517 = vmatprep.mubr.f32.mxu0 %v3548_v0  ;;  %v3588_v0 = vld [vmem:[#allocation56_spill] sm:$0xff]  ;;  %v3621_v13 = vpack.c.bf16 %v3482_v9, %v3481_v27  ;;  %v3628_v9 = vld [vmem:[#allocation98_spill] sm:$0xff]  ;;  %v3629_v27 = vld [vmem:[#allocation99_spill] sm:$0xff] }
  0xe2   : > { %1775 = vmatpush1.bf16.msra.mxu1 %v3549_v48  ;;  %v3589_v48 = vld [vmem:[#allocation55_spill] sm:$0xff]  ;;  %v3611_v62 = vld [vmem:[#allocation72_spill] sm:$0xff] }
  0xe3   : > { %1967 = vmatpush1.bf16.msra.mxu0 %v3550_v12  ;;  %1777 = vmatprep.subr.bf16.mxu1 %v3551_v50  ;;  %v3590_v12 = vpack.c.bf16 %v3588_v0, %v3589_v48  ;;  %v3591_v50 = vld [vmem:[#allocation54_spill] sm:$0xff]  ;;  %v3620_v32 = vld [vmem:[#allocation84_spill] sm:$0xff] }
  0xe4   : > { %1969 = vmatprep.subr.bf16.mxu0 %v3552_v23  ;;  %v3592_v23 = vld [vmem:[#allocation59_spill] sm:$0xff] }
  0xe6   : > { %1779 = vmatpush1.bf16.msra.mxu1 %v3553_v16  ;;  %v3593_v16 = vld [vmem:[#allocation58_spill] sm:$0xff] }
  0xe7   : > { %1971 = vmatpush1.bf16.msra.mxu0 %v3554_v47  ;;  %1781 = vmatprep.subr.bf16.mxu1 %v3555_v59  ;;  %v3594_v47 = vpack.c.bf16 %v3592_v23, %v3593_v16  ;;  %v3596_v59 = vld [vmem:[#allocation62_spill] sm:$0xff] }
  0xe8   : > { %1973 = vmatprep.subr.bf16.mxu0 %v3556_v53  ;;  %v3597_v53 = vld [vmem:[#allocation61_spill] sm:$0xff] }
  0xea   : > { %1783 = vmatpush1.bf16.msra.mxu1 %v3557_v54  ;;  %v3598_v54 = vpack.c.bf16 %v3596_v59, %v3597_v53 }
  0xeb   : > { %1975 = vmatpush1.bf16.msra.mxu0 %v3558_v60  ;;  %1785 = vmatprep.subr.bf16.mxu1 %v3561_v63  ;;  %v3601_v60 = vld [vmem:[#allocation63_spill] sm:$0xff]  ;;  %v3604_v63 = vpack.c.bf16 %v3602_v2, %v3603_v26 }
  0xec   : > { %1977 = vmatprep.subr.bf16.mxu0 %v3562_v46  ;;  %v3605_v46 = vld [vmem:[#allocation66_spill] sm:$0xff] }
  0xee   : > { %1787 = vmatpush1.bf16.msra.mxu1 %v3565_v17  ;;  %v3608_v17 = vpack.c.bf16 %v3606_v29, %v3607_v18 }
  0xef   : > { %1979 = vmatpush1.bf16.msra.mxu0 %v3566_v6  ;;  %1789 = vmatprep.subr.bf16.mxu1 %v3569_v57  ;;  %v3609_v6 = vld [vmem:[#allocation69_spill] sm:$0xff]  ;;  %v3614_v57 = vpack.c.bf16 %v3527_v37, %v3526_v3  ;;  %v3622_v37 = vld [vmem:[#allocation91_spill] sm:$0xff]  ;;  %v3625_v3 = vpack.c.bf16 %v2650_v43, %v2648_v58 }
  0xf0   : > { %1981 = vmatprep.subr.bf16.mxu0 %v3570_v30  ;;  %v3615_v30 = vld [vmem:[#allocation78_spill] sm:$0xff] }
  0xf2   : > { %1791 = vmatpush1.bf16.msra.mxu1 %v3573_v8  ;;  %v3627_v8 = vpack.c.bf16 %v2670_v42, %v2657_v11 }
  0xf3   : > { %1983 = vmatpush1.bf16.msra.mxu0 %v3574_v61  ;;  %1793 = vmatprep.subr.bf16.mxu1 %v3577_v45  ;;  %v3630_v61 = vpack.c.bf16 %v3521_v1, %v3629_v27 }
  0xf4   : > { %1985 = vmatprep.subr.bf16.mxu0 %v3578_v49 }
  0xf6   : > { %1795 = vmatpush1.bf16.msra.mxu1 %v3581_v34 }
  0xf7   : > { %1987 = vmatpush1.bf16.msra.mxu0 %v3582_v51  ;;  %1797 = vmatprep.subr.bf16.mxu1 %v3584_v52 }
  0xf8   : > { %1989 = vmatprep.subr.bf16.mxu0 %v3585_v35 }
  0xfa   : > { %1799 = vmatpush1.bf16.msra.mxu1 %v3586_v41 }
  0xfb   : > { %1991 = vmatpush1.bf16.msra.mxu0 %v3587_v14  ;;  %1801 = vmatprep.subr.bf16.mxu1 %v3590_v12 }
  0xfc   : > { %1993 = vmatprep.subr.bf16.mxu0 %v3591_v50 }
  0xfe   : > { %1803 = vmatpush1.bf16.msra.mxu1 %v3594_v47 }
  0xff   : > { %1995 = vmatpush1.bf16.msra.mxu0 %v3595_v25  ;;  %1805 = vmatprep.subr.bf16.mxu1 %v3598_v54 }
 0x100   : > { %1997 = vmatprep.subr.bf16.mxu0 %v3599_v31 }
 0x102   : > { %1807 = vmatpush1.bf16.msra.mxu1 %v3600_v36 }
 0x103   : > { %1999 = vmatpush1.bf16.msra.mxu0 %v3601_v60  ;;  %1809 = vmatprep.subr.bf16.mxu1 %v3604_v63 }
 0x104   : > { %2001 = vmatprep.subr.bf16.mxu0 %v3605_v46 }
 0x106   : > { %1811 = vmatpush1.bf16.msra.mxu1 %v3608_v17 }
 0x107   : > { %2003 = vmatpush1.bf16.msra.mxu0 %v3609_v6  ;;  %1813 = vmatprep.subr.bf16.mxu1 %v3610_v5 }
 0x108   : > { %2005 = vmatprep.subr.bf16.mxu0 %v3611_v62 }
 0x10a   : > { %1815 = vmatpush1.bf16.msra.mxu1 %v3612_v21 }
 0x10b   : > { %2007 = vmatpush1.bf16.msra.mxu0 %v3613_v20  ;;  %1817 = vmatprep.subr.bf16.mxu1 %v3614_v57 }
 0x10c   : > { %2009 = vmatprep.subr.bf16.mxu0 %v3615_v30 }
 0x10e   : > { %1819 = vmatpush1.bf16.msra.mxu1 %v3616_v10 }
 0x10f   : > { %2011 = vmatpush1.bf16.msra.mxu0 %v3617_v40  ;;  %1821 = vmatprep.subr.bf16.mxu1 %v3619_v38 }
 0x110   : > { %2013 = vmatprep.subr.bf16.mxu0 %v3620_v32 }
 0x112   : > { %1823 = vmatpush1.bf16.msra.mxu1 %v3621_v13 }
 0x113   : > { %2015 = vmatpush1.bf16.msra.mxu0 %v3622_v37  ;;  %1825 = vmatprep.subr.bf16.mxu1 %v3623_v7 }
 0x114   : > { %2017 = vmatprep.subr.bf16.mxu0 %v3624_v44 }
 0x116   : > { %1827 = vmatpush1.bf16.msra.mxu1 %v3625_v3 }
 0x117   : > { %2019 = vmatpush1.bf16.msra.mxu0 %v3626_v28  ;;  %1829 = vmatprep.subr.bf16.mxu1 %v3627_v8 }
 0x118   : > { %2021 = vmatprep.subr.bf16.mxu0 %v3628_v9 }
 0x11a   : > { %1831 = vmatpush1.bf16.msra.mxu1 %v3630_v61 }
 0x11b   : > { %2023 = vmatpush1.bf16.msra.mxu0 %v3631_v39 }
 0x11d   : > { %976 = vmatmul.mubr.f32.vlgmr.msra.gmra.mrb[0].mxu1 %v3632_v22 }
 0x11e   : > { %1519 = vmatmul.mubr.f32.vlgmr.msra.gmra.mrb[0].mxu0 %v3542_v56 }
 0x1f0   : > { %v977_v11 = vpop.f32.mrb[0].mxu1 }
 0x1f1   : > { %v1520_v58 = vpop.f32.mrb[0].mxu0  ;;  %v979_v42 = vpop.f32.mrb[1].mxu1 }
 0x1f2   : > { %v2024_v43 = vadd.f32 %v1520_v58, %v977_v11  ;;  %v1522_v55 = vpop.f32.mrb[1].mxu0 }
 0x1f3   : > { %v2025_v15 = vadd.f32 %v1522_v55, %v979_v42 }
 0x1f4   : > { %1525 = vst [vmem:[%s174_s17] sm:$0xff] %v2024_v43 }
 0x1f5   : > { %1526 = vst [vmem:[%s174_s17 + $0x8] sm:$0xff] %v2025_v15 }
 0x1f6   : > { %2164 = shalt.err (!%p2161_p7)
}
 0x1f7   : > { %s2165_s6 = scalar_lea.hbm %s3154_s28, 256  ;;  %s2169_s24 = scalar_lea.hbm %s3200_s2, 512 }
 0x1f8   : > { %p2166_p9 = scmp.ne.s32.totalorder %s3154_s28, %s2165_s6  ;;  %p2170_p0 = scmp.lt.u32.totalorder %s3154_s28, %s3200_s2 }
 0x1f9   : > { %p2171_p11 = scmp.lt.u32.totalorder %s2169_s24, %s2165_s6  ;;  %p2173_p4 = scmp.lt.u32.totalorder %s2165_s6, %s3154_s28 }
 0x1fa   : > { %p2167_p2 = pnand %p2166_p9, %p2334_p12 }
 0x1fb   : > { %p2172_p1 = por %p2171_p11, %p2170_p0 }
 0x1fc   : > { %p2168_p5 = pneg %p2167_p2 }
 0x1fd   : > { %p2174_p6 = por %p2173_p4, %p2172_p1 }
 0x1ff   : > { %p2175_p8 = pnand %p2174_p6, %p2168_p5 }
 0x201   : > { %2178 = shalt.err (!%p2175_p8)
}
 0x202   : > { %2040 = dma.vmem_to_hbm [thread:$0]  (%p2334_p12), %s3156_s27, 256, %s3154_s28, %s1528_s13  }
 0x203 PF: > { %s1554_s26 = sand.u32 1, %s2209_s9   ;;  %p3633_p10 = scmp.ne.s32.totalorder %s3351_s16, 0 }
 0x204   : > { %p3634_p13 = scmp.ge.s32.totalorder %s2221_s12, 2  ;;  %s1555_s19 = scalar_lea.sflag [#allocation4], %s1554_s26 }
 0x206   : > { %p2051_p3 = pnand %p3634_p13, %p3633_p10 }
 0x208   : > { %2204 = dma.done.wait (!%p2051_p3), %s1555_s19, 256  }
 0x209   : > { %2206 = vsyncadd (!%p2051_p3), %s1555_s19, 4294967040  ;;  %p16_p7 = scmp.ge.s32.totalorder %s2299_s21, 4   ;;  %s3635_s9 = smov %s2213_s10 }
 0x20a   : > { %s3636_s10 = smov %s2217_s11  ;;  %s3637_s11 = smov %s2330_s8 }
 0x20b   : > { %s3638_s12 = smov %s2299_s21  ;;  %18 = sbr.rel (!%p16_p7) target bundleno = 6 (0x6), region = 77 }
 0x212   :  { %1560 = vsyncpa [#allocation3], 1 }
 0x213   :  { %1562 = vsyncpa [#allocation3 + $0x1], 1 }
 0x214   :  { %1563 = vsyncpa [#allocation6], 1 }
 0x215   :  { %1564 = vsyncpa [#allocation4], 1 }
 0x216   :  { %1566 = vsyncpa [#allocation4 + $0x1], 1 }

</bundles_post_ra>
